<compile_context>
chip_gen: v7x
topology: tpu7x:2x2x1
jax: 0.10.0
libtpu: 0.0.40
codegen_flags: <defaults>
</compile_context>

<pallas_src>
import jax
import jax.numpy as jnp
import numpy as np
from jax import lax
from jax.experimental import pallas as pl
from jax.experimental.pallas import tpu as pltpu  # noqa: F401


# ----------------------------------------------------------------------------
# Pallas kernels
# ----------------------------------------------------------------------------
def _stage1_kernel(px1_ref, pux2_ref, pu34_ref, wx1_ref, wu13_ref, wu25_ref,
                   s_ref, x21_ref, x11_ref, x31_ref, cu5_ref):
    """First half of ScMixBlk: three stacked matmuls + fused product epilogue.

    px1:  (9*c1,      n) bf16  im2col of x1
    pux2: (9*c2,      n) bf16  im2col of up(x2)
    pu34: (9*(c3+c4), n) bf16  im2col of up(up(cat(x3, x4)))
    wx1:  (ch, 9*c1)           fused conv_rc_x1 + conv_rc_x1_reshape
    wu13: (2*ch, 9*c2)         stacked conv_upsample1 / conv_upsample3
    wu25: (2*ch, 9*(c3+c4))    block-stacked conv_upsample2 / conv_upsample5
    s:    (5*ch, 1) f32        packed per-channel shifts
    outs: x2_1, x1_1 (bf16), x3_1 (f32), cu5 (bf16), all (ch, n)
    """
    ch = wx1_ref.shape[0]
    s = s_ref[...]
    x1_1 = jnp.dot(wx1_ref[...], px1_ref[...],
                   preferred_element_type=jnp.float32) + s[0:ch]
    t13 = jnp.dot(wu13_ref[...], pux2_ref[...],
                  preferred_element_type=jnp.float32) + s[ch:3 * ch]
    t25 = jnp.dot(wu25_ref[...], pu34_ref[...],
                  preferred_element_type=jnp.float32) + s[3 * ch:5 * ch]
    x2_1 = t13[0:ch] * x1_1            # conv_upsample1(up(x2)) * x1_1
    b_m = t13[ch:2 * ch] * x1_1        # conv_upsample3(up(x2)) * x1_1
    x3_1 = t25[0:ch] * b_m             # conv_upsample2(up(up(x3))) * b_m
    x21_ref[...] = x2_1.astype(x21_ref.dtype)
    x11_ref[...] = x1_1.astype(x11_ref.dtype)
    x31_ref[...] = x3_1.astype(x31_ref.dtype)
    cu5_ref[...] = t25[ch:2 * ch].astype(cu5_ref.dtype)


def _conv_affine_kernel(w_ref, p_ref, s_ref, o_ref):
    # (Cout, K) @ (K, n) + (Cout, 1) -> (Cout, n)
    acc = jnp.dot(w_ref[...], p_ref[...], preferred_element_type=jnp.float32)
    o_ref[...] = (acc + s_ref[...]).astype(o_ref.dtype)


def _conv_affine(wmat, patches, shift_col, out_dtype):
    cout = wmat.shape[0]
    n = patches.shape[1]
    # Whole-array VMEM blocks, single invocation (no grid): everything fits
    # comfortably in VMEM at these shapes on v5e/v6e/v7x.
    return pl.pallas_call(
        _conv_affine_kernel,
        out_shape=jax.ShapeDtypeStruct((cout, n), out_dtype),
    )(wmat, patches, shift_col)


# ----------------------------------------------------------------------------
# XLA-side layout glue (channel-major, im2col, upsample) — fused by jit
# ----------------------------------------------------------------------------
def _cm(x):
    """(B, C, H, W) -> channel-major (C, B*H*W)."""
    B, C, H, W = x.shape
    return jnp.transpose(x, (1, 0, 2, 3)).reshape(C, B * H * W)


def _im2col_cm(xcm, B, H, W):
    """Channel-major (C, B*H*W) -> 3x3 'same' patches (9*C, B*H*W).
    Row index = tap*C + c, tap = kh*3 + kw (matches the weight layout)."""
    C = xcm.shape[0]
    x4d = xcm.reshape(C, B, H, W)
    xp = jnp.pad(x4d, ((0, 0), (0, 0), (1, 1), (1, 1)))
    parts = [xp[:, :, kh:kh + H, kw:kw + W]
             for kh in range(3) for kw in range(3)]
    return jnp.stack(parts, axis=0).reshape(9 * C, B * H * W)


def _up_cm(xcm, u_t):
    """Per-batch bilinear upsample of channel-major data; u_t: (HWin, HWout)."""
    C, tot = xcm.shape
    hw_in, hw_out = u_t.shape
    B = tot // hw_in
    y = jnp.dot(xcm.reshape(C * B, hw_in), u_t,
                precision=lax.Precision.HIGHEST)
    return y.reshape(C, B * hw_out)


# ----------------------------------------------------------------------------
# ScMixBlk forward (Pallas path)
# ----------------------------------------------------------------------------
def sc_mix_blk_forward(prep, x1, x2, x3, x4):
    B, _, H, W = x1.shape
    n = B * H * W
    bf = jnp.bfloat16

    # Layout glue: channel-major, upsample, im2col, bf16 casts.
    p_x1 = _im2col_cm(_cm(x1), B, H, W).astype(bf)
    u_x2 = _up_cm(_cm(x2), prep["U2"])
    p_ux2 = _im2col_cm(u_x2, B, H, W).astype(bf)
    x34 = jnp.concatenate([_cm(x3), _cm(x4)], axis=0)
    u_x34 = _up_cm(x34, prep["U4"])
    p_u34 = _im2col_cm(u_x34, B, H, W).astype(bf)

    ch = prep["w_x1"].shape[0]                      # channel[1] // 2
    x2_1, x1_1, x3_1, cu5 = pl.pallas_call(
        _stage1_kernel,
        out_shape=(jax.ShapeDtypeStruct((ch, n), bf),
                   jax.ShapeDtypeStruct((ch, n), bf),
                   jax.ShapeDtypeStruct((ch, n), jnp.float32),
                   jax.ShapeDtypeStruct((ch, n), bf)),
    )(p_x1, p_ux2, p_u34,
      prep["w_x1"], prep["w_u13"], prep["w_u25"], prep["s1"])

    # x2_2 = conv_concat2(cat(x2_1, x1_1))
    cat21 = jnp.concatenate([x2_1, x1_1], axis=0)
    x2_2 = _conv_affine(prep["w_c2"], _im2col_cm(cat21, B, H, W),
                        prep["s_c2"], jnp.float32)

    # x3_2 = conv_out(conv4(conv_concat3(cat(x2_2, cu5, x3_1))))
    cat3 = jnp.concatenate([x2_2.astype(bf), cu5, x3_1.astype(bf)], axis=0)
    c3 = _conv_affine(prep["w_c3"], _im2col_cm(cat3, B, H, W),
                      prep["s_c3"], bf)
    x3_2 = _conv_affine(prep["w_4o"], _im2col_cm(c3, B, H, W),
                        prep["s_4o"], jnp.float32)

    def to_nchw(xcm):
        return jnp.transpose(xcm.reshape(xcm.shape[0], B, H, W), (1, 0, 2, 3))

    return to_nchw(x3_2), to_nchw(x2_2), to_nchw(x3_1)


sc_mix_blk_pallas = jax.jit(sc_mix_blk_forward)


# ----------------------------------------------------------------------------
# One-time parameter preparation (BN fold, 1x1 fusion, stacking, operators)
# ----------------------------------------------------------------------------
def _interp_matrix_np(n_out, n_in):
    """Row-stochastic bilinear interpolation matrix, align_corners=True."""
    if n_in == 1:
        return np.ones((n_out, 1), np.float32)
    src = np.arange(n_out, dtype=np.float64) * (n_in - 1) / (n_out - 1)
    lo = np.clip(np.floor(src).astype(np.int64), 0, n_in - 2)
    frac = (src - lo).astype(np.float32)
    m = np.zeros((n_out, n_in), np.float32)
    rows = np.arange(n_out)
    m[rows, lo] += 1.0 - frac
    m[rows, lo + 1] += frac
    return m


def _up_operator_np(h_in, w_in, times):
    """Composed (2x)^times bilinear operator, returned as U^T = (HinWin, HoutWout)."""
    uh = np.eye(h_in, dtype=np.float32)
    uw = np.eye(w_in, dtype=np.float32)
    for _ in range(times):
        uh = _interp_matrix_np(2 * uh.shape[0], uh.shape[0]) @ uh
        uw = _interp_matrix_np(2 * uw.shape[0], uw.shape[0]) @ uw
    u = np.kron(uh, uw)                                   # (HWout, HWin)
    return np.ascontiguousarray(u.T.astype(np.float32))


def _w3_to_mat(w3):
    cout, cin = w3.shape[0], w3.shape[1]
    return jnp.transpose(w3, (0, 2, 3, 1)).reshape(cout, 9 * cin)


def _fuse_basic(basic):
    """BasicConv2d (3x3 conv + BN, no ReLU in its forward) -> (Wmat, shift)."""
    w3, scale, shift = basic
    return scale[:, None] * _w3_to_mat(w3), shift


def _fuse_basic_pw(basic, pw):
    """BasicConv2d followed by a 1x1 conv with bias -> one (Wmat, shift)."""
    w3, scale, shift = basic
    w1, b1 = pw
    cmid = w3.shape[0]
    wm3 = scale[:, None] * _w3_to_mat(w3)                 # (Cmid, 9*Cin)
    w1m = w1.reshape(w1.shape[0], cmid)                   # (Cout, Cmid)
    wf = jnp.matmul(w1m, wm3, precision=lax.Precision.HIGHEST)
    sf = jnp.matmul(w1m, shift[:, None],
                    precision=lax.Precision.HIGHEST)[:, 0] + b1
    return wf, sf


def prepare_params(params, H, W):
    """One-time weight fusion / stacking; done outside the per-call forward."""
    p = params
    w_x1, s_x1 = _fuse_basic_pw(p["conv_rc_x1"], p["conv_rc_x1_reshape"])
    w_u1, s_u1 = _fuse_basic_pw(p["conv_upsample1_bc"], p["conv_upsample1_pw"])
    w_u2, s_u2 = _fuse_basic_pw(p["conv_upsample2_bc"], p["conv_upsample2_pw"])
    w_u3, s_u3 = _fuse_basic_pw(p["conv_upsample3_bc"], p["conv_upsample3_pw"])
    w_u5, s_u5 = _fuse_basic_pw(p["conv_upsample5_bc"], p["conv_upsample5_pw"])
    w_c2, s_c2 = _fuse_basic(p["conv_concat2"])
    w_c3, s_c3 = _fuse_basic(p["conv_concat3"])
    w_4o, s_4o = _fuse_basic_pw(p["conv4"], p["conv_out"])

    # Stack the two convs that consume up(x2) patches (both * x1_1 afterwards).
    w_u13 = jnp.concatenate([w_u1, w_u3], axis=0)
    s_u13 = jnp.concatenate([s_u1, s_u3], axis=0)

    # Block-stack conv_upsample2 (x3 channels) and conv_upsample5 (x4 channels)
    # over the concatenated up(up(cat(x3, x4))) patches: column = tap*(c3+c4)+c.
    c3ch = p["conv_upsample2_bc"][0].shape[1]
    c4ch = p["conv_upsample5_bc"][0].shape[1]
    w_u2r = w_u2.reshape(w_u2.shape[0], 9, c3ch)
    w_u5r = w_u5.reshape(w_u5.shape[0], 9, c4ch)
    w_u25 = jnp.concatenate([
        jnp.pad(w_u2r, ((0, 0), (0, 0), (0, c4ch))),
        jnp.pad(w_u5r, ((0, 0), (0, 0), (c3ch, 0))),
    ], axis=0).reshape(w_u2.shape[0] + w_u5.shape[0], 9 * (c3ch + c4ch))
    s_u25 = jnp.concatenate([s_u2, s_u5], axis=0)

    bf = jnp.bfloat16
    return {
        "w_x1": w_x1.astype(bf), "w_u13": w_u13.astype(bf),
        "w_u25": w_u25.astype(bf), "w_c2": w_c2.astype(bf),
        "w_c3": w_c3.astype(bf), "w_4o": w_4o.astype(bf),
        "s1": jnp.concatenate([s_x1, s_u13, s_u25])[:, None].astype(jnp.float32),
        "s_c2": s_c2[:, None].astype(jnp.float32),
        "s_c3": s_c3[:, None].astype(jnp.float32),
        "s_4o": s_4o[:, None].astype(jnp.float32),
        # Bilinear upsample operators (align_corners=True), kept in f32.
        "U2": jnp.asarray(_up_operator_np(H // 2, W // 2, 1)),
        "U4": jnp.asarray(_up_operator_np(H // 4, W // 4, 2)),
    }


# ----------------------------------------------------------------------------
# Pure-JAX f32 reference (lax.conv / einsum upsample) for validation
# ----------------------------------------------------------------------------
def _ref_conv3(x, w, scale, shift):
    y = lax.conv_general_dilated(
        x, w, (1, 1), ((1, 1), (1, 1)),
        dimension_numbers=("NCHW", "OIHW", "NCHW"),
        precision=lax.Precision.HIGHEST)
    return y * scale[None, :, None, None] + shift[None, :, None, None]


def _ref_conv1(x, w, bias):
    y = lax.conv_general_dilated(
        x, w, (1, 1), "VALID",
        dimension_numbers=("NCHW", "OIHW", "NCHW"),
        precision=lax.Precision.HIGHEST)
    return y + bias[None, :, None, None]


def _ref_up(x):
    B, C, H, W = x.shape
    uh = jnp.asarray(_interp_matrix_np(2 * H, H))
    uw = jnp.asarray(_interp_matrix_np(2 * W, W))
    return jnp.einsum("oh,pw,bchw->bcop", uh, uw, x,
                      precision=lax.Precision.HIGHEST)


def sc_mix_blk_ref(params, x1, x2, x3, x4):
    p = params
    up = _ref_up
    x1_1 = _ref_conv1(_ref_conv3(x1, *p["conv_rc_x1"]),
                      *p["conv_rc_x1_reshape"])
    u_x2 = up(x2)
    x2_1 = _ref_conv1(_ref_conv3(u_x2, *p["conv_upsample1_bc"]),
                      *p["conv_upsample1_pw"]) * x1_1
    a = _ref_conv1(_ref_conv3(up(up(x3)), *p["conv_upsample2_bc"]),
                   *p["conv_upsample2_pw"])
    b = _ref_conv1(_ref_conv3(u_x2, *p["conv_upsample3_bc"]),
                   *p["conv_upsample3_pw"])
    x3_1 = a * b * x1_1
    x2_2 = _ref_conv3(jnp.concatenate((x2_1, x1_1), axis=1),
                      *p["conv_concat2"])
    cu5 = _ref_conv1(_ref_conv3(up(up(x4)), *p["conv_upsample5_bc"]),
                     *p["conv_upsample5_pw"])
    x3_2 = jnp.concatenate((x2_2, cu5, x3_1), axis=1)
    x3_2 = _ref_conv3(x3_2, *p["conv_concat3"])
    x3_2 = _ref_conv3(x3_2, *p["conv4"])
    x3_2 = _ref_conv1(x3_2, *p["conv_out"])
    return x3_2, x2_2, x3_1


# ----------------------------------------------------------------------------
# Deterministic parameter init
# ----------------------------------------------------------------------------
def _bn_fold(gamma, beta, mean, var, eps=1e-5):
    scale = gamma / jnp.sqrt(var + eps)
    shift = beta - mean * scale
    return scale, shift


def init_basic(key, cin, cout):
    k1, k2, k3, k4, k5 = jax.random.split(key, 5)
    w = 0.1 * jax.random.normal(k1, (cout, cin, 3, 3), jnp.float32)
    gamma = 1.0 + 0.1 * jax.random.normal(k2, (cout,), jnp.float32)
    beta = 0.1 * jax.random.normal(k3, (cout,), jnp.float32)
    mean = 0.1 * jax.random.normal(k4, (cout,), jnp.float32)
    var = jnp.abs(jax.random.normal(k5, (cout,), jnp.float32)) + 0.5
    scale, shift = _bn_fold(gamma, beta, mean, var)
    return w, scale, shift


def init_pw(key, cin, cout):
    k1, k2 = jax.random.split(key)
    w = 0.1 * jax.random.normal(k1, (cout, cin, 1, 1), jnp.float32)
    b = 0.1 * jax.random.normal(k2, (cout,), jnp.float32)
    return w, b


if __name__ == "__main__":
    # channel = [_, c1, c2, c3, c4]
    channel = [0, 8, 16, 16, 16]
    c1, c2, c3, c4 = channel[1], channel[2], channel[3], channel[4]
    B, H, W = 2, 16, 16

    keys = iter(jax.random.split(jax.random.PRNGKey(0), 32))
    params = {
        "conv_rc_x1": init_basic(next(keys), c1, c1),
        "conv_rc_x1_reshape": init_pw(next(keys), c1, c1 // 2),
        "conv_upsample1_bc": init_basic(next(keys), c2, c2),
        "conv_upsample1_pw": init_pw(next(keys), c2, c1 // 2),
        "conv_upsample2_bc": init_basic(next(keys), c3, c3),
        "conv_upsample2_pw": init_pw(next(keys), c3, c1 // 2),
        "conv_upsample3_bc": init_basic(next(keys), c2, c2),
        "conv_upsample3_pw": init_pw(next(keys), c2, c1 // 2),
        "conv_upsample5_bc": init_basic(next(keys), c4, c4),
        "conv_upsample5_pw": init_pw(next(keys), c4, c1 // 2),
        "conv_concat2": init_basic(next(keys), c1, c1),
        "conv_concat3": init_basic(next(keys), 2 * c1, 2 * c1),
        "conv4": init_basic(next(keys), 2 * c1, 2 * c1),
        "conv_out": init_pw(next(keys), 2 * c1, c1),
    }

    # Inputs (NCHW, matching the PyTorch module's expectations).
    x1 = jax.random.normal(next(keys), (B, c1, H, W), jnp.float32)
    x2 = jax.random.normal(next(keys), (B, c2, H // 2, W // 2), jnp.float32)
    x3 = jax.random.normal(next(keys), (B, c3, H // 4, W // 4), jnp.float32)
    x4 = jax.random.normal(next(keys), (B, c4, H // 4, W // 4), jnp.float32)

    # One-time weight fusion / operator construction (hoisted out of forward).
    prep = jax.block_until_ready(prepare_params(params, H, W))

    out = jax.block_until_ready(sc_mix_blk_pallas(prep, x1, x2, x3, x4))
    x3_2, x2_2, x3_1 = out

    # Validate against a pure-JAX f32 reference.  The Pallas path feeds the
    # MXU bf16 inputs with f32 accumulation across a fused multi-conv chain,
    # so compare at bf16-level tolerance.
    r3_2, r2_2, r3_1 = jax.block_until_ready(
        jax.jit(sc_mix_blk_ref)(params, x1, x2, x3, x4))
    for got, want in ((x3_2, r3_2), (x2_2, r2_2), (x3_1, r3_1)):
        np.testing.assert_allclose(np.asarray(got), np.asarray(want),
                                   rtol=3e-2, atol=3e-2)

    print("KERNEL_OK")
</pallas_src>

<mosaic_0001>
module attributes {stable_mosaic.version = 11 : i64} {
  func.func @_stage1_kernel(%arg0: memref<72x512xbf16, #tpu.memory_space<vmem>>, %arg1: memref<144x512xbf16, #tpu.memory_space<vmem>>, %arg2: memref<288x512xbf16, #tpu.memory_space<vmem>>, %arg3: memref<4x72xbf16, #tpu.memory_space<vmem>>, %arg4: memref<8x144xbf16, #tpu.memory_space<vmem>>, %arg5: memref<8x288xbf16, #tpu.memory_space<vmem>>, %arg6: memref<20x1xf32, #tpu.memory_space<vmem>>, %arg7: memref<4x512xbf16, #tpu.memory_space<vmem>>, %arg8: memref<4x512xbf16, #tpu.memory_space<vmem>>, %arg9: memref<4x512xf32, #tpu.memory_space<vmem>>, %arg10: memref<4x512xbf16, #tpu.memory_space<vmem>>) attributes {dimension_semantics = [], scalar_prefetch = 0 : i64, scratch_operands = 0 : i64, tpu.core_type = #tpu.core_type<tc>} {
    %c0 = arith.constant 0 : index
    %c0_0 = arith.constant 0 : index
    %0 = vector.load %arg6[%c0, %c0_0] : memref<20x1xf32, #tpu.memory_space<vmem>>, vector<20x1xf32>
    %c0_1 = arith.constant 0 : index
    %c0_2 = arith.constant 0 : index
    %1 = vector.load %arg3[%c0_1, %c0_2] : memref<4x72xbf16, #tpu.memory_space<vmem>>, vector<4x72xbf16>
    %c0_3 = arith.constant 0 : index
    %c0_4 = arith.constant 0 : index
    %2 = vector.load %arg0[%c0_3, %c0_4] : memref<72x512xbf16, #tpu.memory_space<vmem>>, vector<72x512xbf16>
    %cst = arith.constant dense<0.000000e+00> : vector<4x512xf32>
    %3 = tpu.matmul %1, %2, %cst {dimension_numbers = #tpu.dot_dimension_numbers<[1], [0], [0], [1], [0, 0, 1, 1], [], []>} : vector<4x72xbf16>, vector<72x512xbf16>, vector<4x512xf32> -> vector<4x512xf32>
    %4 = vector.extract_strided_slice %0 {offsets = [0, 0], sizes = [4, 1], strides = [1, 1]} : vector<20x1xf32> to vector<4x1xf32>
    %5 = vector.broadcast %4 : vector<4x1xf32> to vector<4x512xf32>
    %6 = arith.addf %3, %5 : vector<4x512xf32>
    %c0_5 = arith.constant 0 : index
    %c0_6 = arith.constant 0 : index
    %7 = vector.load %arg4[%c0_5, %c0_6] : memref<8x144xbf16, #tpu.memory_space<vmem>>, vector<8x144xbf16>
    %c0_7 = arith.constant 0 : index
    %c0_8 = arith.constant 0 : index
    %8 = vector.load %arg1[%c0_7, %c0_8] : memref<144x512xbf16, #tpu.memory_space<vmem>>, vector<144x512xbf16>
    %cst_9 = arith.constant dense<0.000000e+00> : vector<8x512xf32>
    %9 = tpu.matmul %7, %8, %cst_9 {dimension_numbers = #tpu.dot_dimension_numbers<[1], [0], [0], [1], [0, 0, 1, 1], [], []>} : vector<8x144xbf16>, vector<144x512xbf16>, vector<8x512xf32> -> vector<8x512xf32>
    %10 = vector.extract_strided_slice %0 {offsets = [4, 0], sizes = [8, 1], strides = [1, 1]} : vector<20x1xf32> to vector<8x1xf32>
    %11 = vector.broadcast %10 : vector<8x1xf32> to vector<8x512xf32>
    %12 = arith.addf %9, %11 : vector<8x512xf32>
    %c0_10 = arith.constant 0 : index
    %c0_11 = arith.constant 0 : index
    %13 = vector.load %arg5[%c0_10, %c0_11] : memref<8x288xbf16, #tpu.memory_space<vmem>>, vector<8x288xbf16>
    %c0_12 = arith.constant 0 : index
    %c0_13 = arith.constant 0 : index
    %14 = vector.load %arg2[%c0_12, %c0_13] : memref<288x512xbf16, #tpu.memory_space<vmem>>, vector<288x512xbf16>
    %cst_14 = arith.constant dense<0.000000e+00> : vector<8x512xf32>
    %15 = tpu.matmul %13, %14, %cst_14 {dimension_numbers = #tpu.dot_dimension_numbers<[1], [0], [0], [1], [0, 0, 1, 1], [], []>} : vector<8x288xbf16>, vector<288x512xbf16>, vector<8x512xf32> -> vector<8x512xf32>
    %16 = vector.extract_strided_slice %0 {offsets = [12, 0], sizes = [8, 1], strides = [1, 1]} : vector<20x1xf32> to vector<8x1xf32>
    %17 = vector.broadcast %16 : vector<8x1xf32> to vector<8x512xf32>
    %18 = arith.addf %15, %17 : vector<8x512xf32>
    %19 = vector.extract_strided_slice %12 {offsets = [0, 0], sizes = [4, 512], strides = [1, 1]} : vector<8x512xf32> to vector<4x512xf32>
    %20 = arith.mulf %19, %6 : vector<4x512xf32>
    %21 = vector.extract_strided_slice %12 {offsets = [4, 0], sizes = [4, 512], strides = [1, 1]} : vector<8x512xf32> to vector<4x512xf32>
    %22 = arith.mulf %21, %6 : vector<4x512xf32>
    %23 = vector.extract_strided_slice %18 {offsets = [0, 0], sizes = [4, 512], strides = [1, 1]} : vector<8x512xf32> to vector<4x512xf32>
    %24 = arith.mulf %23, %22 : vector<4x512xf32>
    %25 = arith.truncf %20 : vector<4x512xf32> to vector<4x512xbf16>
    %c0_15 = arith.constant 0 : index
    %c0_16 = arith.constant 0 : index
    %26 = vector.load %arg7[%c0_15, %c0_16] : memref<4x512xbf16, #tpu.memory_space<vmem>>, vector<4x512xbf16>
    tpu.vector_store %arg7[%c0_15, %c0_16], %25 {strides = array<i32>} : memref<4x512xbf16, #tpu.memory_space<vmem>>, vector<4x512xbf16>,
    %27 = arith.truncf %6 : vector<4x512xf32> to vector<4x512xbf16>
    %c0_17 = arith.constant 0 : index
    %c0_18 = arith.constant 0 : index
    %28 = vector.load %arg8[%c0_17, %c0_18] : memref<4x512xbf16, #tpu.memory_space<vmem>>, vector<4x512xbf16>
    tpu.vector_store %arg8[%c0_17, %c0_18], %27 {strides = array<i32>} : memref<4x512xbf16, #tpu.memory_space<vmem>>, vector<4x512xbf16>,
    %c0_19 = arith.constant 0 : index
    %c0_20 = arith.constant 0 : index
    %29 = vector.load %arg9[%c0_19, %c0_20] : memref<4x512xf32, #tpu.memory_space<vmem>>, vector<4x512xf32>
    tpu.vector_store %arg9[%c0_19, %c0_20], %24 {strides = array<i32>} : memref<4x512xf32, #tpu.memory_space<vmem>>, vector<4x512xf32>,
    %30 = vector.extract_strided_slice %18 {offsets = [4, 0], sizes = [4, 512], strides = [1, 1]} : vector<8x512xf32> to vector<4x512xf32>
    %31 = arith.truncf %30 : vector<4x512xf32> to vector<4x512xbf16>
    %c0_21 = arith.constant 0 : index
    %c0_22 = arith.constant 0 : index
    %32 = vector.load %arg10[%c0_21, %c0_22] : memref<4x512xbf16, #tpu.memory_space<vmem>>, vector<4x512xbf16>
    tpu.vector_store %arg10[%c0_21, %c0_22], %31 {strides = array<i32>} : memref<4x512xbf16, #tpu.memory_space<vmem>>, vector<4x512xbf16>,
    return
  }
}

module attributes {stable_mosaic.version = 11 : i64} {
  func.func @_conv_affine_kernel(%arg0: memref<8x72xbf16, #tpu.memory_space<vmem>>, %arg1: memref<72x512xbf16, #tpu.memory_space<vmem>>, %arg2: memref<8x1xf32, #tpu.memory_space<vmem>>, %arg3: memref<8x512xf32, #tpu.memory_space<vmem>>) attributes {dimension_semantics = [], scalar_prefetch = 0 : i64, scratch_operands = 0 : i64, tpu.core_type = #tpu.core_type<tc>} {
    %c0 = arith.constant 0 : index
    %c0_0 = arith.constant 0 : index
    %0 = vector.load %arg0[%c0, %c0_0] : memref<8x72xbf16, #tpu.memory_space<vmem>>, vector<8x72xbf16>
    %c0_1 = arith.constant 0 : index
    %c0_2 = arith.constant 0 : index
    %1 = vector.load %arg1[%c0_1, %c0_2] : memref<72x512xbf16, #tpu.memory_space<vmem>>, vector<72x512xbf16>
    %cst = arith.constant dense<0.000000e+00> : vector<8x512xf32>
    %2 = tpu.matmul %0, %1, %cst {dimension_numbers = #tpu.dot_dimension_numbers<[1], [0], [0], [1], [0, 0, 1, 1], [], []>} : vector<8x72xbf16>, vector<72x512xbf16>, vector<8x512xf32> -> vector<8x512xf32>
    %c0_3 = arith.constant 0 : index
    %c0_4 = arith.constant 0 : index
    %3 = vector.load %arg2[%c0_3, %c0_4] : memref<8x1xf32, #tpu.memory_space<vmem>>, vector<8x1xf32>
    %4 = vector.broadcast %3 : vector<8x1xf32> to vector<8x512xf32>
    %5 = arith.addf %2, %4 : vector<8x512xf32>
    %c0_5 = arith.constant 0 : index
    %c0_6 = arith.constant 0 : index
    %6 = vector.load %arg3[%c0_5, %c0_6] : memref<8x512xf32, #tpu.memory_space<vmem>>, vector<8x512xf32>
    tpu.vector_store %arg3[%c0_5, %c0_6], %5 {strides = array<i32>} : memref<8x512xf32, #tpu.memory_space<vmem>>, vector<8x512xf32>,
    return
  }
}

module attributes {stable_mosaic.version = 11 : i64} {
  func.func @_conv_affine_kernel(%arg0: memref<8x144xbf16, #tpu.memory_space<vmem>>, %arg1: memref<144x512xbf16, #tpu.memory_space<vmem>>, %arg2: memref<8x1xf32, #tpu.memory_space<vmem>>, %arg3: memref<8x512xf32, #tpu.memory_space<vmem>>) attributes {dimension_semantics = [], scalar_prefetch = 0 : i64, scratch_operands = 0 : i64, tpu.core_type = #tpu.core_type<tc>} {
    %c0 = arith.constant 0 : index
    %c0_0 = arith.constant 0 : index
    %0 = vector.load %arg0[%c0, %c0_0] : memref<8x144xbf16, #tpu.memory_space<vmem>>, vector<8x144xbf16>
    %c0_1 = arith.constant 0 : index
    %c0_2 = arith.constant 0 : index
    %1 = vector.load %arg1[%c0_1, %c0_2] : memref<144x512xbf16, #tpu.memory_space<vmem>>, vector<144x512xbf16>
    %cst = arith.constant dense<0.000000e+00> : vector<8x512xf32>
    %2 = tpu.matmul %0, %1, %cst {dimension_numbers = #tpu.dot_dimension_numbers<[1], [0], [0], [1], [0, 0, 1, 1], [], []>} : vector<8x144xbf16>, vector<144x512xbf16>, vector<8x512xf32> -> vector<8x512xf32>
    %c0_3 = arith.constant 0 : index
    %c0_4 = arith.constant 0 : index
    %3 = vector.load %arg2[%c0_3, %c0_4] : memref<8x1xf32, #tpu.memory_space<vmem>>, vector<8x1xf32>
    %4 = vector.broadcast %3 : vector<8x1xf32> to vector<8x512xf32>
    %5 = arith.addf %2, %4 : vector<8x512xf32>
    %c0_5 = arith.constant 0 : index
    %c0_6 = arith.constant 0 : index
    %6 = vector.load %arg3[%c0_5, %c0_6] : memref<8x512xf32, #tpu.memory_space<vmem>>, vector<8x512xf32>
    tpu.vector_store %arg3[%c0_5, %c0_6], %5 {strides = array<i32>} : memref<8x512xf32, #tpu.memory_space<vmem>>, vector<8x512xf32>,
    return
  }
}

module attributes {stable_mosaic.version = 11 : i64} {
  func.func @_conv_affine_kernel(%arg0: memref<16x144xbf16, #tpu.memory_space<vmem>>, %arg1: memref<144x512xbf16, #tpu.memory_space<vmem>>, %arg2: memref<16x1xf32, #tpu.memory_space<vmem>>, %arg3: memref<16x512xbf16, #tpu.memory_space<vmem>>) attributes {dimension_semantics = [], scalar_prefetch = 0 : i64, scratch_operands = 0 : i64, tpu.core_type = #tpu.core_type<tc>} {
    %c0 = arith.constant 0 : index
    %c0_0 = arith.constant 0 : index
    %0 = vector.load %arg0[%c0, %c0_0] : memref<16x144xbf16, #tpu.memory_space<vmem>>, vector<16x144xbf16>
    %c0_1 = arith.constant 0 : index
    %c0_2 = arith.constant 0 : index
    %1 = vector.load %arg1[%c0_1, %c0_2] : memref<144x512xbf16, #tpu.memory_space<vmem>>, vector<144x512xbf16>
    %cst = arith.constant dense<0.000000e+00> : vector<16x512xf32>
    %2 = tpu.matmul %0, %1, %cst {dimension_numbers = #tpu.dot_dimension_numbers<[1], [0], [0], [1], [0, 0, 1, 1], [], []>} : vector<16x144xbf16>, vector<144x512xbf16>, vector<16x512xf32> -> vector<16x512xf32>
    %c0_3 = arith.constant 0 : index
    %c0_4 = arith.constant 0 : index
    %3 = vector.load %arg2[%c0_3, %c0_4] : memref<16x1xf32, #tpu.memory_space<vmem>>, vector<16x1xf32>
    %4 = vector.broadcast %3 : vector<16x1xf32> to vector<16x512xf32>
    %5 = arith.addf %2, %4 : vector<16x512xf32>
    %6 = arith.truncf %5 : vector<16x512xf32> to vector<16x512xbf16>
    %c0_5 = arith.constant 0 : index
    %c0_6 = arith.constant 0 : index
    %7 = vector.load %arg3[%c0_5, %c0_6] : memref<16x512xbf16, #tpu.memory_space<vmem>>, vector<16x512xbf16>
    tpu.vector_store %arg3[%c0_5, %c0_6], %6 {strides = array<i32>} : memref<16x512xbf16, #tpu.memory_space<vmem>>, vector<16x512xbf16>,
    return
  }
}

</mosaic_0001>

<bundles_post_ra>
// kernel: sc_mix_blk_forward.4
= control target key start
LH: loop header
LB: loop body
LE: loop exit
PB: predicated region body
PF: predicated region fallthrough
CT: control target
= control target key end

     0   :  { %v1684_v1 = vmov 0   ;;  %vm152_vm0 = vcmask 1043456   ;;  %vm148_vm1 = vcmask 588800   ;;  %vm478_vm2 = vcmask 130048   ;;  %s2181_s0 = inlined_call_operand.vmem [shape: bf16[72,512], index: 0, kind: input, shape index: {}]   ;;  %s2182_s1 = inlined_call_operand.vmem [shape: bf16[144,512], index: 1, kind: input, shape index: {}]   ;;  %s2183_s3 = inlined_call_operand.vmem [shape: bf16[4,72], index: 3, kind: input, shape index: {}]   ;;  %s2184_s4 = inlined_call_operand.vmem [shape: bf16[8,144], index: 4, kind: input, shape index: {}]   ;;  %s2185_s2 = inlined_call_operand.vmem [shape: bf16[288,512], index: 2, kind: input, shape index: {}]   ;;  %s2186_s6 = inlined_call_operand.vmem [shape: f32[20,1], index: 6, kind: input, shape index: {}]   ;;  %s2187_s5 = inlined_call_operand.vmem [shape: bf16[8,288], index: 5, kind: input, shape index: {}]   ;;  %s2188_s8 = inlined_call_operand.vmem [shape: bf16[4,512], index: 8, kind: output, shape index: {1}]   ;;  %s2189_s7 = inlined_call_operand.vmem [shape: bf16[4,512], index: 7, kind: output, shape index: {0}]   ;;  %s2190_s9 = inlined_call_operand.vmem [shape: f32[4,512], index: 9, kind: output, shape index: {2}]   ;;  %s2191_s10 = inlined_call_operand.vmem [shape: bf16[4,512], index: 10, kind: output, shape index: {3}]  }
   0x1   :  { %v1489_v0 = vld [vmem:[%s2181_s0 + $0x4] ss:$16 sps:$4 sm:$0xff]   ;;  %197 = vmatprep.mubr.bf16.mxu0 %v1684_v1  ;;  %238 = vmatprep.mubr.bf16.mxu1 %v1684_v1  ;;  %v1491_v2 = vld [vmem:[%s2181_s0 + $0xc] ss:$16 sps:$4 sm:$0xff]   ;;  %v1493_v3 = vld [vmem:[%s2181_s0] ss:$16 sps:$4 sm:$0xff]  }
   0x2   :  { %1487 = vset.pattern.permute.xlu0 %v1684_v1  ;;  %1488 = vset.pattern.permute.xlu1 %v1684_v1  ;;  %v1494_v4 = vld [vmem:[%s2181_s0 + $0x8] ss:$16 sps:$4 sm:$0xff]   ;;  %v1495_v5 = vld [vmem:[%s2181_s0 + $0x24] ss:$16 sps:$4 sm:$0xff]   ;;  %v1497_v6 = vld [vmem:[%s2181_s0 + $0x2c] ss:$16 sps:$4 sm:$0xff]  }
   0x3   :  { %165 = vmatprep.subr.bf16.mxu0 %v1489_v0  ;;  %206 = vmatprep.subr.bf16.mxu1 %v1491_v2  ;;  %v1499_v7 = vld [vmem:[%s2181_s0 + $0x20] ss:$16 sps:$4 sm:$0xff]   ;;  %v1500_v8 = vld [vmem:[%s2181_s0 + $0x28] ss:$16 sps:$4 sm:$0xff]   ;;  %v1501_v9 = vld [vmem:[%s2181_s0 + $0x44] ss:$16 sps:$4 sm:$0xff]  }
   0x4   :  { %166 = vmatpush1.bf16.msra.mxu0 %v1493_v3  ;;  %207 = vmatpush1.bf16.msra.mxu1 %v1494_v4  ;;  %v1503_v10 = vld [vmem:[%s2181_s0 + $0x4c] ss:$16 sps:$4 sm:$0xff]   ;;  %v1505_v11 = vld [vmem:[%s2181_s0 + $0x40] ss:$16 sps:$4 sm:$0xff]   ;;  %v1506_v12 = vld [vmem:[%s2181_s0 + $0x48] ss:$16 sps:$4 sm:$0xff]  }
   0x5   :  { %167 = vmatprep.subr.bf16.mxu0 %v1495_v5  ;;  %208 = vmatprep.subr.bf16.mxu1 %v1497_v6  ;;  %v1507_v13 = vld [vmem:[%s2181_s0 + $0x64] ss:$16 sps:$4 sm:$0xff]   ;;  %v1509_v14 = vld [vmem:[%s2181_s0 + $0x6c] ss:$16 sps:$4 sm:$0xff]   ;;  %v1511_v17 = vld [vmem:[%s2181_s0 + $0x60] ss:$16 sps:$4 sm:$0xff]  }
   0x6   :  { %v51_v15 = vld [vmem:[%s2181_s0 + $0x80] sm:$0xff]  ;;  %v52_v16 = vld [vmem:[%s2181_s0 + $0x88] sm:$0xff]  ;;  %vm1015_vm3 = vcmask 261120  }
   0x7   :  { %v1512_v18 = vld [vmem:[%s2181_s0 + $0x68] ss:$16 sps:$4 sm:$0xff]   ;;  %v1343_v19 = vcombine.high %v51_v15, %v51_v15  ;;  %v1345_v20 = vcombine.high %v52_v16, %v52_v16  ;;  %v1342_v21 = vcombine.low %v51_v15, %v51_v15  ;;  %v1344_v22 = vcombine.low %v52_v16, %v52_v16  ;;  %v1519_v23 = vld [vmem:[%s2182_s1 + $0x4] ss:$16 sps:$4 sm:$0xff]   ;;  %v1522_v26 = vld [vmem:[%s2182_s1 + $0xc] ss:$16 sps:$4 sm:$0xff]  }
   0x8   :  { %168 = vmatpush1.bf16.msra.mxu0 %v1499_v7  ;;  %209 = vmatpush1.bf16.msra.mxu1 %v1500_v8  ;;  %v34_v27 = vld [vmem:[%s2183_s3] sm:$0x3]  ;;  %v1520_v29 = vld [vmem:[%s2182_s1 + $0x8] ss:$16 sps:$4 sm:$0xff]   ;;  %v1525_v30 = vld [vmem:[%s2182_s1 + $0x24] ss:$16 sps:$4 sm:$0xff]  }
   0x9   :  { %169 = vmatprep.subr.bf16.mxu0 %v1501_v9  ;;  %210 = vmatprep.subr.bf16.mxu1 %v1503_v10  ;;  %v154_v24 = vsel %vm152_vm0, %v1342_v21, 0  ;;  %v160_v25 = vsel %vm152_vm0, %v1344_v22, 0  ;;  %v1517_v28 = vld [vmem:[%s2182_s1] ss:$16 sps:$4 sm:$0xff]   ;;  %v1528_v31 = vld [vmem:[%s2182_s1 + $0x2c] ss:$16 sps:$4 sm:$0xff]  }
   0xa   :  { %v1523_v32 = vld [vmem:[%s2182_s1 + $0x20] ss:$16 sps:$4 sm:$0xff]   ;;  %v1526_v33 = vld [vmem:[%s2182_s1 + $0x28] ss:$16 sps:$4 sm:$0xff]   ;;  %v1531_v34 = vld [vmem:[%s2182_s1 + $0x44] ss:$16 sps:$4 sm:$0xff]  }
   0xb   :  { %v1534_v35 = vld [vmem:[%s2182_s1 + $0x4c] ss:$16 sps:$4 sm:$0xff]   ;;  %v1529_v36 = vld [vmem:[%s2182_s1 + $0x40] ss:$16 sps:$4 sm:$0xff]   ;;  %v1532_v37 = vld [vmem:[%s2182_s1 + $0x48] ss:$16 sps:$4 sm:$0xff]  }
   0xc   :  { %170 = vmatpush1.bf16.msra.mxu0 %v1505_v11  ;;  %211 = vmatpush1.bf16.msra.mxu1 %v1506_v12  ;;  %v1537_v38 = vld [vmem:[%s2182_s1 + $0x64] ss:$16 sps:$4 sm:$0xff]   ;;  %v1540_v39 = vld [vmem:[%s2182_s1 + $0x6c] ss:$16 sps:$4 sm:$0xff]   ;;  %v1535_v40 = vld [vmem:[%s2182_s1 + $0x60] ss:$16 sps:$4 sm:$0xff]  }
   0xd   :  { %171 = vmatprep.subr.bf16.mxu0 %v1507_v13  ;;  %212 = vmatprep.subr.bf16.mxu1 %v1509_v14  ;;  %v1538_v41 = vld [vmem:[%s2182_s1 + $0x68] ss:$16 sps:$4 sm:$0xff]   ;;  %v1543_v42 = vld [vmem:[%s2182_s1 + $0x84] ss:$16 sps:$4 sm:$0xff]   ;;  %v1546_v43 = vld [vmem:[%s2182_s1 + $0x8c] ss:$16 sps:$4 sm:$0xff]  }
   0xe   :  { %v1541_v44 = vld [vmem:[%s2182_s1 + $0x80] ss:$16 sps:$4 sm:$0xff]   ;;  %v1544_v45 = vld [vmem:[%s2182_s1 + $0x88] ss:$16 sps:$4 sm:$0xff]   ;;  %v1549_v47 = vld [vmem:[%s2182_s1 + $0xa4] ss:$16 sps:$4 sm:$0xff]  }
   0xf   :  { %v247_v46 = vld [vmem:[%s2184_s4] sm:$0xff]  ;;  %v1552_v49 = vld [vmem:[%s2182_s1 + $0xac] ss:$16 sps:$4 sm:$0xff]   ;;  %v1550_v51 = vld [vmem:[%s2182_s1 + $0xa8] ss:$16 sps:$4 sm:$0xff]  }
  0x10   :  { %172 = vmatpush1.bf16.msra.mxu0 %v1511_v17  ;;  %213 = vmatpush1.bf16.msra.mxu1 %v1512_v18  ;;  %v1351_v48 = vcombine.high %v247_v46, %v247_v46  ;;  %v1547_v50 = vld [vmem:[%s2182_s1 + $0xa0] ss:$16 sps:$4 sm:$0xff]   ;;  %v1555_v52 = vld [vmem:[%s2182_s1 + $0xc4] ss:$16 sps:$4 sm:$0xff]   ;;  %v1558_v53 = vld [vmem:[%s2182_s1 + $0xcc] ss:$16 sps:$4 sm:$0xff]   ;;  %v1350_v3 = vcombine.low %v247_v46, %v247_v46 }
  0x11   :  { %1346 = vmatprep.subr.msk.bf16.mxu0 %vm152_vm0, %v1343_v19  ;;  %1348 = vmatprep.subr.msk.bf16.mxu1 %vm152_vm0, %v1345_v20  ;;  %v1553_v54 = vld [vmem:[%s2182_s1 + $0xc0] ss:$16 sps:$4 sm:$0xff]   ;;  %v1556_v55 = vld [vmem:[%s2182_s1 + $0xc8] ss:$16 sps:$4 sm:$0xff]   ;;  %v1561_v56 = vld [vmem:[%s2182_s1 + $0xe4] ss:$16 sps:$4 sm:$0xff]  }
  0x12   :  { %v1564_v57 = vld [vmem:[%s2182_s1 + $0xec] ss:$16 sps:$4 sm:$0xff]   ;;  %v1559_v58 = vld [vmem:[%s2182_s1 + $0xe0] ss:$16 sps:$4 sm:$0xff]   ;;  %v1562_v59 = vld [vmem:[%s2182_s1 + $0xe8] ss:$16 sps:$4 sm:$0xff]  }
  0x13   :  { %v1567_v60 = vld [vmem:[%s2182_s1 + $0x104] ss:$16 sps:$4 sm:$0xff]   ;;  %v1570_v61 = vld [vmem:[%s2182_s1 + $0x10c] ss:$16 sps:$4 sm:$0xff]   ;;  %v1565_v62 = vld [vmem:[%s2182_s1 + $0x100] ss:$16 sps:$4 sm:$0xff]  }
  0x14   :  { %174 = vmatpush1.bf16.msra.mxu0 %v154_v24  ;;  %215 = vmatpush1.bf16.msra.mxu1 %v160_v25  ;;  %v1568_v63 = vld [vmem:[%s2182_s1 + $0x108] ss:$16 sps:$4 sm:$0xff]   ;;  %v1575_v0 = vld [vmem:[%s2185_s2 + $0x4] ss:$16 sps:$4 sm:$0xff]   ;;  %v1578_v2 = vld [vmem:[%s2185_s2 + $0xc] ss:$16 sps:$4 sm:$0xff]  }
  0x15   :  { %482 = vmatprep.subr.bf16.mxu0 %v1519_v23  ;;  %523 = vmatprep.subr.bf16.mxu1 %v1522_v26  ;;  %v1573_v4 = vld [vmem:[%s2185_s2] ss:$16 sps:$4 sm:$0xff]   ;;  %v1576_v5 = vld [vmem:[%s2185_s2 + $0x8] ss:$16 sps:$4 sm:$0xff]   ;;  %v1581_v6 = vld [vmem:[%s2185_s2 + $0x24] ss:$16 sps:$4 sm:$0xff]  }
  0x16   :  { %v1584_v7 = vld [vmem:[%s2185_s2 + $0x2c] ss:$16 sps:$4 sm:$0xff]   ;;  %v1579_v8 = vld [vmem:[%s2185_s2 + $0x20] ss:$16 sps:$4 sm:$0xff]   ;;  %v1582_v9 = vld [vmem:[%s2185_s2 + $0x28] ss:$16 sps:$4 sm:$0xff]  }
  0x17   :  { %1347 = vmatmul.mubr.msk.bf16.vlgmr.msra.gmra.mrb[0].mxu0 %vm148_vm1, %v34_v27  ;;  %1349 = vmatmul.mubr.msk.bf16.vlgmr.msra.gmra.mrb[0].mxu1 %vm148_vm1, %v34_v27  ;;  %v1587_v10 = vld [vmem:[%s2185_s2 + $0x44] ss:$16 sps:$4 sm:$0xff]   ;;  %v1590_v11 = vld [vmem:[%s2185_s2 + $0x4c] ss:$16 sps:$4 sm:$0xff]   ;;  %v1585_v12 = vld [vmem:[%s2185_s2 + $0x40] ss:$16 sps:$4 sm:$0xff]  }
  0x18   :  { %483 = vmatpush1.bf16.msra.mxu0 %v1517_v28  ;;  %524 = vmatpush1.bf16.msra.mxu1 %v1520_v29  ;;  %v1588_v13 = vld [vmem:[%s2185_s2 + $0x48] ss:$16 sps:$4 sm:$0xff]   ;;  %v1593_v14 = vld [vmem:[%s2185_s2 + $0x64] ss:$16 sps:$4 sm:$0xff]   ;;  %v1596_v15 = vld [vmem:[%s2185_s2 + $0x6c] ss:$16 sps:$4 sm:$0xff]  }
  0x19   :  { %484 = vmatprep.subr.bf16.mxu0 %v1525_v30  ;;  %525 = vmatprep.subr.bf16.mxu1 %v1528_v31  ;;  %v1591_v16 = vld [vmem:[%s2185_s2 + $0x60] ss:$16 sps:$4 sm:$0xff]   ;;  %v1594_v17 = vld [vmem:[%s2185_s2 + $0x68] ss:$16 sps:$4 sm:$0xff]   ;;  %v1599_v18 = vld [vmem:[%s2185_s2 + $0x84] ss:$16 sps:$4 sm:$0xff]  }
  0x1a   :  { %1388 = vmatprep.mubr.msk.bf16.mxu0 %vm478_vm2, %v1351_v48  ;;  %1389 = vmatprep.mubr.msk.bf16.mxu1 %vm478_vm2, %v1351_v48  ;;  %v1602_v19 = vld [vmem:[%s2185_s2 + $0x8c] ss:$16 sps:$4 sm:$0xff]   ;;  %v31_v20 = vld [vmem:[%s2186_s6] sm:$0xff]  ;;  %v1600_v22 = vld [vmem:[%s2185_s2 + $0x88] ss:$16 sps:$4 sm:$0xff]  }
  0x1b   :  { %v1597_v21 = vld [vmem:[%s2185_s2 + $0x80] ss:$16 sps:$4 sm:$0xff]   ;;  %55 = vperm.xlu0 %1487, %v31_v20   ;;  %v1605_v23 = vld [vmem:[%s2185_s2 + $0xa4] ss:$16 sps:$4 sm:$0xff]   ;;  %v1608_v24 = vld [vmem:[%s2185_s2 + $0xac] ss:$16 sps:$4 sm:$0xff]   ;;  %v1232_v20 = vlaneseq }
  0x1c   :  { %485 = vmatpush1.bf16.msra.mxu0 %v1523_v32  ;;  %526 = vmatpush1.bf16.msra.mxu1 %v1526_v33  ;;  %v1603_v25 = vld [vmem:[%s2185_s2 + $0xa0] ss:$16 sps:$4 sm:$0xff]   ;;  %v1606_v26 = vld [vmem:[%s2185_s2 + $0xa8] ss:$16 sps:$4 sm:$0xff]   ;;  %v1611_v27 = vld [vmem:[%s2185_s2 + $0xc4] ss:$16 sps:$4 sm:$0xff]  }
  0x1d   :  { %486 = vmatprep.subr.bf16.mxu0 %v1531_v34  ;;  %527 = vmatprep.subr.bf16.mxu1 %v1534_v35  ;;  %v1614_v28 = vld [vmem:[%s2185_s2 + $0xcc] ss:$16 sps:$4 sm:$0xff]   ;;  %v1609_v29 = vld [vmem:[%s2185_s2 + $0xc0] ss:$16 sps:$4 sm:$0xff]   ;;  %v1612_v30 = vld [vmem:[%s2185_s2 + $0xc8] ss:$16 sps:$4 sm:$0xff]  }
  0x1e   :  { %v2007_v31 = vld [vmem:[%s2187_s5] sm:$0xff]  ;;  %v1620_v34 = vld [vmem:[%s2185_s2 + $0xec] ss:$16 sps:$4 sm:$0xff]   ;;  %v1630_v46 = vld [vmem:[%s2185_s2 + $0x128] ss:$16 sps:$4 sm:$0xff]  }
  0x1f   :  { %v1617_v32 = vld [vmem:[%s2185_s2 + $0xe4] ss:$16 sps:$4 sm:$0xff]   ;;  %v1391_v33 = vcombine.high %v2007_v31, %v2007_v31  ;;  %v1615_v35 = vld [vmem:[%s2185_s2 + $0xe0] ss:$16 sps:$4 sm:$0xff]   ;;  %v1638_v48 = vld [vmem:[%s2185_s2 + $0x14c] ss:$16 sps:$4 sm:$0xff]  }
  0x20   :  { %487 = vmatpush1.bf16.msra.mxu0 %v1529_v36  ;;  %528 = vmatpush1.bf16.msra.mxu1 %v1532_v37  ;;  %v1618_v36 = vld [vmem:[%s2185_s2 + $0xe8] ss:$16 sps:$4 sm:$0xff]   ;;  %v1623_v37 = vld [vmem:[%s2185_s2 + $0x104] ss:$16 sps:$4 sm:$0xff]  }
  0x21   :  { %488 = vmatprep.subr.bf16.mxu0 %v1537_v38  ;;  %529 = vmatprep.subr.bf16.mxu1 %v1540_v39  ;;  %v1626_v38 = vld [vmem:[%s2185_s2 + $0x10c] ss:$16 sps:$4 sm:$0xff]  }
  0x22   :  { %v32_v39 = vld [vmem:[%s2186_s6 + $0x8] sm:$0xff] }
  0x23   :  { %286 = vperm.xlu0 %1487, %v32_v39  }
  0x24   :  { %489 = vmatpush1.bf16.msra.mxu0 %v1535_v40  ;;  %530 = vmatpush1.bf16.msra.mxu1 %v1538_v41  ;;  %v33_v40 = vld [vmem:[%s2186_s6 + $0x10] sm:$0xf] }
  0x25   :  { %490 = vmatprep.subr.bf16.mxu0 %v1543_v42  ;;  %531 = vmatprep.subr.bf16.mxu1 %v1546_v43  ;;  %v1621_v41 = vld [vmem:[%s2185_s2 + $0x100] ss:$16 sps:$4 sm:$0xff]   ;;  %v1624_v42 = vld [vmem:[%s2185_s2 + $0x108] ss:$16 sps:$4 sm:$0xff]   ;;  %v1629_v43 = vld [vmem:[%s2185_s2 + $0x124] ss:$16 sps:$4 sm:$0xff]  }
  0x26   :  { %640 = vperm.xlu1 %1488, %v33_v40  }
  0x28   :  { %491 = vmatpush1.bf16.msra.mxu0 %v1541_v44  ;;  %532 = vmatpush1.bf16.msra.mxu1 %v1544_v45  ;;  %v1632_v44 = vld [vmem:[%s2185_s2 + $0x12c] ss:$16 sps:$4 sm:$0xff]   ;;  %v1627_v45 = vld [vmem:[%s2185_s2 + $0x120] ss:$16 sps:$4 sm:$0xff]  }
  0x29   :  { %492 = vmatprep.subr.bf16.mxu0 %v1549_v47  ;;  %533 = vmatprep.subr.bf16.mxu1 %v1552_v49  ;;  %v1635_v47 = vld [vmem:[%s2185_s2 + $0x144] ss:$16 sps:$4 sm:$0xff]   ;;  %v1633_v49 = vld [vmem:[%s2185_s2 + $0x140] ss:$16 sps:$4 sm:$0xff]  }
  0x2c   :  { %493 = vmatpush1.bf16.msra.mxu0 %v1547_v50  ;;  %534 = vmatpush1.bf16.msra.mxu1 %v1550_v51  ;;  %v1636_v50 = vld [vmem:[%s2185_s2 + $0x148] ss:$16 sps:$4 sm:$0xff]   ;;  %v1641_v51 = vld [vmem:[%s2185_s2 + $0x164] ss:$16 sps:$4 sm:$0xff]  }
  0x2d   :  { %494 = vmatprep.subr.bf16.mxu0 %v1555_v52  ;;  %535 = vmatprep.subr.bf16.mxu1 %v1558_v53  ;;  %v1644_v52 = vld [vmem:[%s2185_s2 + $0x16c] ss:$16 sps:$4 sm:$0xff]   ;;  %v1639_v53 = vld [vmem:[%s2185_s2 + $0x160] ss:$16 sps:$4 sm:$0xff]  }
  0x30   :  { %495 = vmatpush1.bf16.msra.mxu0 %v1553_v54  ;;  %536 = vmatpush1.bf16.msra.mxu1 %v1556_v55  ;;  %v1642_v54 = vld [vmem:[%s2185_s2 + $0x168] ss:$16 sps:$4 sm:$0xff]   ;;  %v1647_v55 = vld [vmem:[%s2185_s2 + $0x184] ss:$16 sps:$4 sm:$0xff]  }
  0x31   :  { %496 = vmatprep.subr.bf16.mxu0 %v1561_v56  ;;  %537 = vmatprep.subr.bf16.mxu1 %v1564_v57  ;;  %v1650_v56 = vld [vmem:[%s2185_s2 + $0x18c] ss:$16 sps:$4 sm:$0xff]   ;;  %v1645_v57 = vld [vmem:[%s2185_s2 + $0x180] ss:$16 sps:$4 sm:$0xff]  }
  0x34   :  { %497 = vmatpush1.bf16.msra.mxu0 %v1559_v58  ;;  %538 = vmatpush1.bf16.msra.mxu1 %v1562_v59  ;;  %v1648_v58 = vld [vmem:[%s2185_s2 + $0x188] ss:$16 sps:$4 sm:$0xff]   ;;  %v1653_v59 = vld [vmem:[%s2185_s2 + $0x1a4] ss:$16 sps:$4 sm:$0xff]  }
  0x35   :  { %498 = vmatprep.subr.bf16.mxu0 %v1567_v60  ;;  %539 = vmatprep.subr.bf16.mxu1 %v1570_v61  ;;  %v1656_v60 = vld [vmem:[%s2185_s2 + $0x1ac] ss:$16 sps:$4 sm:$0xff]   ;;  %v1651_v61 = vld [vmem:[%s2185_s2 + $0x1a0] ss:$16 sps:$4 sm:$0xff]  }
  0x38   :  { %499 = vmatpush1.bf16.msra.mxu0 %v1565_v62  ;;  %540 = vmatpush1.bf16.msra.mxu1 %v1568_v63  ;;  %v1654_v62 = vld [vmem:[%s2185_s2 + $0x1a8] ss:$16 sps:$4 sm:$0xff]   ;;  %v1659_v63 = vld [vmem:[%s2185_s2 + $0x1c4] ss:$16 sps:$4 sm:$0xff]  }
  0x39   :  { %1019 = vmatprep.subr.bf16.mxu0 %v1575_v0  ;;  %1101 = vmatprep.subr.bf16.mxu1 %v1578_v2  ;;  %v1662_v0 = vld [vmem:[%s2185_s2 + $0x1cc] ss:$16 sps:$4 sm:$0xff]   ;;  %v1657_v2 = vld [vmem:[%s2185_s2 + $0x1c0] ss:$16 sps:$4 sm:$0xff]  }
  0x3b   :  { %515 = vmatmul.mubr.bf16.vlgmr.msra.gmra.mrb[4].mxu0 %v1350_v3  ;;  %556 = vmatmul.mubr.bf16.vlgmr.msra.gmra.mrb[4].mxu1 %v1350_v3  ;;  %v1660_v3 = vld [vmem:[%s2185_s2 + $0x1c8] ss:$16 sps:$4 sm:$0xff]  }
  0x3c   :  { %1020 = vmatpush1.bf16.msra.mxu0 %v1573_v4  ;;  %1102 = vmatpush1.bf16.msra.mxu1 %v1576_v5  ;;  %v1665_v4 = vld [vmem:[%s2185_s2 + $0x1e4] ss:$16 sps:$4 sm:$0xff]   ;;  %v1668_v5 = vld [vmem:[%s2185_s2 + $0x1ec] ss:$16 sps:$4 sm:$0xff]  }
  0x3d   :  { %1021 = vmatprep.subr.bf16.mxu0 %v1581_v6  ;;  %1103 = vmatprep.subr.bf16.mxu1 %v1584_v7  ;;  %v1663_v6 = vld [vmem:[%s2185_s2 + $0x1e0] ss:$16 sps:$4 sm:$0xff]   ;;  %v1666_v7 = vld [vmem:[%s2185_s2 + $0x1e8] ss:$16 sps:$4 sm:$0xff]  }
  0x3e   :  { %1051 = vmatprep.mubr.bf16.mxu0 %v1391_v33  ;;  %1133 = vmatprep.mubr.bf16.mxu1 %v1391_v33 }
  0x40   :  { %1022 = vmatpush1.bf16.msra.mxu0 %v1579_v8  ;;  %1104 = vmatpush1.bf16.msra.mxu1 %v1582_v9  ;;  %v1674_v8 = vld [vmem:[%s2185_s2 + $0x204] ss:$16 sps:$4 sm:$0xff]   ;;  %v1677_v9 = vld [vmem:[%s2185_s2 + $0x20c] ss:$16 sps:$4 sm:$0xff]  }
  0x41   :  { %1023 = vmatprep.subr.bf16.mxu0 %v1587_v10  ;;  %1105 = vmatprep.subr.bf16.mxu1 %v1590_v11  ;;  %v1390_v10 = vcombine.low %v2007_v31, %v2007_v31  ;;  %v1672_v11 = vld [vmem:[%s2185_s2 + $0x200] ss:$16 sps:$4 sm:$0xff]  }
  0x44   :  { %1024 = vmatpush1.bf16.msra.mxu0 %v1585_v12  ;;  %1106 = vmatpush1.bf16.msra.mxu1 %v1588_v13  ;;  %v1675_v12 = vld [vmem:[%s2185_s2 + $0x208] ss:$16 sps:$4 sm:$0xff]   ;;  %v1680_v13 = vld [vmem:[%s2185_s2 + $0x224] ss:$16 sps:$4 sm:$0xff]  }
  0x45   :  { %1025 = vmatprep.subr.bf16.mxu0 %v1593_v14  ;;  %1107 = vmatprep.subr.bf16.mxu1 %v1596_v15  ;;  %v1683_v14 = vld [vmem:[%s2185_s2 + $0x22c] ss:$16 sps:$4 sm:$0xff]   ;;  %v1678_v15 = vld [vmem:[%s2185_s2 + $0x220] ss:$16 sps:$4 sm:$0xff]  }
  0x48   :  { %1026 = vmatpush1.bf16.msra.mxu0 %v1591_v16  ;;  %1108 = vmatpush1.bf16.msra.mxu1 %v1594_v17  ;;  %v1681_v16 = vld [vmem:[%s2185_s2 + $0x228] ss:$16 sps:$4 sm:$0xff]  }
  0x49   :  { %1027 = vmatprep.subr.bf16.mxu0 %v1599_v18  ;;  %1109 = vmatprep.subr.bf16.mxu1 %v1602_v19  ;;  %v1671_v17 = vld [vmem:[%s2187_s5 + $0x8] ss:$0 sps:$4 sm:$0xff]   ;;  %v1685_v18 = vmov 1983009808  }
  0x4a   :  { %v1230_v19 = vunpack.c.l.s4 %v1685_v18 }
  0x4c   :  { %1028 = vmatpush1.bf16.msra.mxu0 %v1597_v21  ;;  %1110 = vmatpush1.bf16.msra.mxu1 %v1600_v22  ;;  %v1231_v22 = vunpack.c.0.s8 %v1230_v19 }
  0x4d   :  { %1029 = vmatprep.subr.bf16.mxu0 %v1605_v23  ;;  %1111 = vmatprep.subr.bf16.mxu1 %v1608_v24  ;;  %v1233_v23 = vshrl.u32 %v1232_v20, 7 }
  0x50   :  { %1030 = vmatpush1.bf16.msra.mxu0 %v1603_v25  ;;  %1112 = vmatpush1.bf16.msra.mxu1 %v1606_v26 }
  0x51   :  { %1031 = vmatprep.subr.bf16.mxu0 %v1611_v27  ;;  %1113 = vmatprep.subr.bf16.mxu1 %v1614_v28 }
  0x54   :  { %1032 = vmatpush1.bf16.msra.mxu0 %v1609_v29  ;;  %1114 = vmatpush1.bf16.msra.mxu1 %v1612_v30  ;;  %v2156_v30 = vsub.s32 %v1231_v22, %v1233_v23 }
  0x55   :  { %1033 = vmatprep.subr.bf16.mxu0 %v1617_v32  ;;  %1115 = vmatprep.subr.bf16.mxu1 %v1620_v34 }
  0x58   :  { %1034 = vmatpush1.bf16.msra.mxu0 %v1615_v35  ;;  %1116 = vmatpush1.bf16.msra.mxu1 %v1618_v36 }
  0x59   :  { %1035 = vmatprep.subr.bf16.mxu0 %v1623_v37  ;;  %1117 = vmatprep.subr.bf16.mxu1 %v1626_v38 }
  0x5c   :  { %1036 = vmatpush1.bf16.msra.mxu0 %v1621_v41  ;;  %1118 = vmatpush1.bf16.msra.mxu1 %v1624_v42 }
  0x5d   :  { %1037 = vmatprep.subr.bf16.mxu0 %v1629_v43  ;;  %1119 = vmatprep.subr.bf16.mxu1 %v1632_v44 }
  0x60   :  { %1038 = vmatpush1.bf16.msra.mxu0 %v1627_v45  ;;  %1120 = vmatpush1.bf16.msra.mxu1 %v1630_v46 }
  0x61   :  { %1039 = vmatprep.subr.bf16.mxu0 %v1635_v47  ;;  %1121 = vmatprep.subr.bf16.mxu1 %v1638_v48 }
  0x64   :  { %1040 = vmatpush1.bf16.msra.mxu0 %v1633_v49  ;;  %1122 = vmatpush1.bf16.msra.mxu1 %v1636_v50 }
  0x65   :  { %1041 = vmatprep.subr.bf16.mxu0 %v1641_v51  ;;  %1123 = vmatprep.subr.bf16.mxu1 %v1644_v52 }
  0x68   :  { %1042 = vmatpush1.bf16.msra.mxu0 %v1639_v53  ;;  %1124 = vmatpush1.bf16.msra.mxu1 %v1642_v54 }
  0x69   :  { %1043 = vmatprep.subr.bf16.mxu0 %v1647_v55  ;;  %1125 = vmatprep.subr.bf16.mxu1 %v1650_v56 }
  0x6c   :  { %1044 = vmatpush1.bf16.msra.mxu0 %v1645_v57  ;;  %1126 = vmatpush1.bf16.msra.mxu1 %v1648_v58 }
  0x6d   :  { %1045 = vmatprep.subr.bf16.mxu0 %v1653_v59  ;;  %1127 = vmatprep.subr.bf16.mxu1 %v1656_v60 }
  0x70   :  { %1046 = vmatpush1.bf16.msra.mxu0 %v1651_v61  ;;  %1128 = vmatpush1.bf16.msra.mxu1 %v1654_v62 }
  0x71   :  { %1047 = vmatprep.subr.bf16.mxu0 %v1659_v63  ;;  %1129 = vmatprep.subr.bf16.mxu1 %v1662_v0 }
  0x74   :  { %1048 = vmatpush1.bf16.msra.mxu0 %v1657_v2  ;;  %1130 = vmatpush1.bf16.msra.mxu1 %v1660_v3 }
  0x75   :  { %1049 = vmatprep.subr.bf16.mxu0 %v1665_v4  ;;  %1131 = vmatprep.subr.bf16.mxu1 %v1668_v5 }
  0x78   :  { %1050 = vmatpush1.bf16.msra.mxu0 %v1663_v6  ;;  %1132 = vmatpush1.bf16.msra.mxu1 %v1666_v7 }
  0x79   :  { %1060 = vmatprep.subr.bf16.mxu0 %v1674_v8  ;;  %1142 = vmatprep.subr.bf16.mxu1 %v1677_v9 }
  0x7b   :  { %1052 = vmatmul.mubr.bf16.vlgmr.msra.gmra.mrb[8].mxu0 %v1390_v10  ;;  %1134 = vmatmul.mubr.bf16.vlgmr.msra.gmra.mrb[8].mxu1 %v1390_v10 }
  0x7c   :  { %1061 = vmatpush1.bf16.msra.mxu0 %v1672_v11  ;;  %1143 = vmatpush1.bf16.msra.mxu1 %v1675_v12 }
  0x7d   :  { %1062 = vmatprep.subr.bf16.mxu0 %v1680_v13  ;;  %1144 = vmatprep.subr.bf16.mxu1 %v1683_v14 }
  0x7e   :  { %1092 = vmatprep.mubr.bf16.mxu0 %v1684_v1  ;;  %1174 = vmatprep.mubr.bf16.mxu1 %v1684_v1 }
  0x80   :  { %1063 = vmatpush1.bf16.msra.mxu0 %v1678_v15  ;;  %1145 = vmatpush1.bf16.msra.mxu1 %v1681_v16 }
  0x87   :  { %1465 = vmatmul.mubr.msk.bf16.vlgmr.msra.gmra.mrb[8].mxu0 %vm1015_vm3, %v1671_v17  ;;  %1466 = vmatmul.mubr.msk.bf16.vlgmr.msra.gmra.mrb[8].mxu1 %vm1015_vm3, %v1671_v17 }
  0x9a   :  { %v56_v21 = vpop.permute.xlu0 %55 }
  0x9b   :  { %v474_v42 = vrot.slane %v56_v21, 4 }
  0xa2   :  { %v287_v41 = vpop.permute.xlu0 %286 }
  0xa3   :  { %v475_v43 = vrot.slane %v287_v41, 4 }
  0xa5   :  { %v476_v44 = vsel %vm152_vm0, %v474_v42, %v475_v43  ;;  %v641_v11 = vpop.permute.xlu1 %640 }
  0xa6   :  { %v1012_v12 = vrot.slane %v641_v11, 4 }
  0xa8   :  { %v1013_v13 = vsel %vm152_vm0, %v475_v43, %v1012_v12 }
  0xea   :  { %v199_v24 = vpop.f32.mrb[0].mxu0  ;;  %v240_v25 = vpop.f32.mrb[0].mxu1 }
  0xeb   :  { %v200_v26 = vadd.f32 %v199_v24, %v56_v21  ;;  %v241_v27 = vadd.f32 %v240_v25, %v56_v21  ;;  %v201_v1 = vpop.f32.mrb[1].mxu0  ;;  %v242_v28 = vpop.f32.mrb[1].mxu1 }
  0xec   :  { %v202_v29 = vadd.f32 %v201_v1, %v56_v21  ;;  %v243_v31 = vadd.f32 %v242_v28, %v56_v21  ;;  %v203_v32 = vpop.f32.mrb[2].mxu0  ;;  %v244_v33 = vpop.f32.mrb[2].mxu1 }
  0xed   :  { %v204_v34 = vpop.f32.mrb[3].mxu0  ;;  %v245_v35 = vpop.f32.mrb[3].mxu1  ;;  %v1191_v48 = vrot.slane %v200_v26, 4  ;;  %v1193_v50 = vrot.slane %v241_v27, 4 }
  0xee   :  { %v1469_v36 = vpack.c.bf16 %v202_v29, %v200_v26  ;;  %v1470_v37 = vpack.c.bf16 %v243_v31, %v241_v27  ;;  %v1192_v54 = vrot.slane %v202_v29, 4  ;;  %v1194_v56 = vrot.slane %v243_v31, 4 }
  0xf0   :  { %v1262_v38 = vrot.slane %v1469_v36, %v2156_v30  ;;  %v1269_v39 = vrot.slane %v1470_v37, %v2156_v30 }
  0xf2   :  { %v1270_v40 = vcombine.low %v1262_v38, %v1269_v39 }
  0xf4   :  { %1272 = vst [vmem:[%s2188_s8] sm:$0xff] %v1270_v40 }
 0x10e   :  { %v516_v45 = vpop.f32.mrb[4].mxu0  ;;  %v557_v46 = vpop.f32.mrb[4].mxu1 }
 0x10f   :  { %v517_v47 = vadd.f32 %v516_v45, %v476_v44  ;;  %v558_v49 = vadd.f32 %v557_v46, %v476_v44  ;;  %v518_v51 = vpop.f32.mrb[5].mxu0  ;;  %v559_v52 = vpop.f32.mrb[5].mxu1 }
 0x110   :  { %v519_v53 = vadd.f32 %v518_v51, %v476_v44  ;;  %v560_v55 = vadd.f32 %v559_v52, %v476_v44  ;;  %v520_v57 = vpop.f32.mrb[6].mxu0  ;;  %v561_v58 = vpop.f32.mrb[6].mxu1 }
 0x111   :  { %v1183_v59 = vmul.f32 %v517_v47, %v200_v26  ;;  %v1199_v60 = vmul.f32 %v1191_v48, %v517_v47  ;;  %v1185_v61 = vmul.f32 %v558_v49, %v241_v27  ;;  %v1201_v62 = vmul.f32 %v1193_v50, %v558_v49  ;;  %v521_v63 = vpop.f32.mrb[7].mxu0  ;;  %v562_v0 = vpop.f32.mrb[7].mxu1 }
 0x112   :  { %v1184_v2 = vmul.f32 %v519_v53, %v202_v29  ;;  %v1200_v3 = vmul.f32 %v1192_v54, %v519_v53  ;;  %v1186_v4 = vmul.f32 %v560_v55, %v243_v31  ;;  %v1202_v5 = vmul.f32 %v1194_v56, %v560_v55 }
 0x113   :  { %v1207_v16 = vrot.slane %v1199_v60, 4  ;;  %v1209_v17 = vrot.slane %v1201_v62, 4 }
 0x114   :  { %v1467_v6 = vpack.c.bf16 %v1184_v2, %v1183_v59  ;;  %v1468_v7 = vpack.c.bf16 %v1186_v4, %v1185_v61  ;;  %v1208_v22 = vrot.slane %v1200_v3, 4  ;;  %v1210_v23 = vrot.slane %v1202_v5, 4 }
 0x116   :  { %v1235_v8 = vrot.slane %v1467_v6, %v2156_v30  ;;  %v1242_v9 = vrot.slane %v1468_v7, %v2156_v30 }
 0x118   :  { %v1243_v10 = vcombine.low %v1235_v8, %v1242_v9 }
 0x11a   :  { %1245 = vst [vmem:[%s2189_s7] sm:$0xff] %v1243_v10 }
 0x15a   :  { %v1094_v14 = vpop.f32.mrb[8].mxu0  ;;  %v1176_v15 = vpop.f32.mrb[8].mxu1 }
 0x15b   :  { %v1473_v18 = vadd.f32 %v1094_v14, %v1013_v13  ;;  %v1475_v19 = vadd.f32 %v1176_v15, %v1013_v13  ;;  %v1096_v20 = vpop.f32.mrb[9].mxu0  ;;  %v1178_v21 = vpop.f32.mrb[9].mxu1 }
 0x15c   :  { %v1474_v24 = vadd.f32 %v1096_v20, %v1013_v13  ;;  %v1476_v25 = vadd.f32 %v1178_v21, %v1013_v13  ;;  %v1098_v26 = vpop.f32.mrb[10].mxu0  ;;  %v1180_v27 = vpop.f32.mrb[10].mxu1 }
 0x15d   :  { %v1215_v1 = vmul.f32 %v1473_v18, %v1207_v16  ;;  %v1217_v28 = vmul.f32 %v1475_v19, %v1209_v17  ;;  %v1099_v29 = vpop.f32.mrb[11].mxu0  ;;  %v1181_v31 = vpop.f32.mrb[11].mxu1 }
 0x15e   :  { %v1216_v32 = vmul.f32 %v1474_v24, %v1208_v22  ;;  %v1471_v33 = vpack.c.bf16 %v1474_v24, %v1473_v18  ;;  %v1218_v34 = vmul.f32 %v1476_v25, %v1210_v23  ;;  %v1472_v35 = vpack.c.bf16 %v1476_v25, %v1475_v19 }
 0x160   :  { %v1277_v36 = vcombine.low %v1215_v1, %v1216_v32  ;;  %v1299_v37 = vrot.slane %v1471_v33, %v2156_v30  ;;  %v1278_v38 = vcombine.low %v1217_v28, %v1218_v34  ;;  %v1306_v39 = vrot.slane %v1472_v35, %v2156_v30 }
 0x162   :  { %1281 = vst [vmem:[%s2190_s9] sm:$0xff] %v1277_v36  ;;  %1282 = vst [vmem:[%s2190_s9 + $0x8] sm:$0xff] %v1278_v38  ;;  %v1307_v40 = vcombine.high %v1299_v37, %v1306_v39 }
 0x164   :  { %1309 = vst [vmem:[%s2191_s10] sm:$0xff] %v1307_v40 }

// kernel: sc_mix_blk_forward.5
= control target key start
LH: loop header
LB: loop body
LE: loop exit
PB: predicated region body
PF: predicated region fallthrough
CT: control target
= control target key end

     0   :  { %v291_v1 = vmov 0   ;;  %vm134_vm0 = vcmask 1043456   ;;  %vm130_vm1 = vcmask 588800   ;;  %s384_s1 = inlined_call_operand.vmem [shape: bf16[72,512], index: 1, kind: input, shape index: {}]   ;;  %s385_s2 = inlined_call_operand.vmem [shape: f32[8,1], index: 2, kind: input, shape index: {}]   ;;  %s386_s0 = inlined_call_operand.vmem [shape: bf16[8,72], index: 0, kind: input, shape index: {}]   ;;  %s387_s3 = inlined_call_operand.vmem [shape: f32[8,512], index: 3, kind: output, shape index: {}]  }
   0x1   :  { %v263_v0 = vld [vmem:[%s384_s1 + $0x4] ss:$16 sps:$4 sm:$0xff]   ;;  %179 = vmatprep.mubr.bf16.mxu0 %v291_v1  ;;  %220 = vmatprep.mubr.bf16.mxu1 %v291_v1  ;;  %v265_v2 = vld [vmem:[%s384_s1 + $0xc] ss:$16 sps:$4 sm:$0xff]   ;;  %v267_v3 = vld [vmem:[%s384_s1] ss:$16 sps:$4 sm:$0xff]  }
   0x2   :  { %262 = vset.pattern.permute.xlu0 %v291_v1  ;;  %147 = vmatprep.subr.bf16.mxu0 %v263_v0  ;;  %v268_v4 = vld [vmem:[%s384_s1 + $0x8] ss:$16 sps:$4 sm:$0xff]   ;;  %v269_v5 = vld [vmem:[%s384_s1 + $0x24] ss:$16 sps:$4 sm:$0xff]   ;;  %v271_v6 = vld [vmem:[%s384_s1 + $0x2c] ss:$16 sps:$4 sm:$0xff]  }
   0x3   :  { %188 = vmatprep.subr.bf16.mxu1 %v265_v2  ;;  %148 = vmatpush1.bf16.msra.mxu0 %v267_v3  ;;  %v273_v7 = vld [vmem:[%s384_s1 + $0x20] ss:$16 sps:$4 sm:$0xff]   ;;  %v274_v8 = vld [vmem:[%s384_s1 + $0x28] ss:$16 sps:$4 sm:$0xff]   ;;  %v275_v9 = vld [vmem:[%s384_s1 + $0x44] ss:$16 sps:$4 sm:$0xff]  }
   0x4   :  { %189 = vmatpush1.bf16.msra.mxu1 %v268_v4  ;;  %149 = vmatprep.subr.bf16.mxu0 %v269_v5  ;;  %v277_v10 = vld [vmem:[%s384_s1 + $0x4c] ss:$16 sps:$4 sm:$0xff]   ;;  %v279_v11 = vld [vmem:[%s384_s1 + $0x40] ss:$16 sps:$4 sm:$0xff]   ;;  %v280_v12 = vld [vmem:[%s384_s1 + $0x48] ss:$16 sps:$4 sm:$0xff]  }
   0x5   :  { %190 = vmatprep.subr.bf16.mxu1 %v271_v6  ;;  %v281_v13 = vld [vmem:[%s384_s1 + $0x64] ss:$16 sps:$4 sm:$0xff]   ;;  %v283_v14 = vld [vmem:[%s384_s1 + $0x6c] ss:$16 sps:$4 sm:$0xff]   ;;  %v285_v18 = vld [vmem:[%s384_s1 + $0x60] ss:$16 sps:$4 sm:$0xff]  }
   0x6   :  { %v32_v15 = vld [vmem:[%s384_s1 + $0x80] sm:$0xff]  ;;  %v33_v16 = vld [vmem:[%s384_s1 + $0x88] sm:$0xff] }
   0x7   :  { %150 = vmatpush1.bf16.msra.mxu0 %v273_v7  ;;  %v34_v17 = vld [vmem:[%s385_s2] sm:$0xff]  ;;  %v286_v19 = vld [vmem:[%s384_s1 + $0x68] ss:$16 sps:$4 sm:$0xff]   ;;  %v254_v20 = vcombine.high %v32_v15, %v32_v15  ;;  %v256_v21 = vcombine.high %v33_v16, %v33_v16  ;;  %v253_v22 = vcombine.low %v32_v15, %v32_v15  ;;  %v255_v23 = vcombine.low %v33_v16, %v33_v16 }
   0x8   :  { %191 = vmatpush1.bf16.msra.mxu1 %v274_v8  ;;  %151 = vmatprep.subr.bf16.mxu0 %v275_v9  ;;  %v15_v26 = vld [vmem:[%s386_s0] sm:$0xf] }
   0x9   :  { %192 = vmatprep.subr.bf16.mxu1 %v277_v10  ;;  %37 = vperm.xlu0 %262, %v34_v17   ;;  %v136_v24 = vsel %vm134_vm0, %v253_v22, 0  ;;  %v142_v25 = vsel %vm134_vm0, %v255_v23, 0 }
   0xb   :  { %152 = vmatpush1.bf16.msra.mxu0 %v279_v11 }
   0xc   :  { %193 = vmatpush1.bf16.msra.mxu1 %v280_v12  ;;  %153 = vmatprep.subr.bf16.mxu0 %v281_v13 }
   0xd   :  { %194 = vmatprep.subr.bf16.mxu1 %v283_v14 }
   0xf   :  { %154 = vmatpush1.bf16.msra.mxu0 %v285_v18 }
  0x10   :  { %195 = vmatpush1.bf16.msra.mxu1 %v286_v19  ;;  %257 = vmatprep.subr.msk.bf16.mxu0 %vm134_vm0, %v254_v20 }
  0x11   :  { %259 = vmatprep.subr.msk.bf16.mxu1 %vm134_vm0, %v256_v21 }
  0x13   :  { %156 = vmatpush1.bf16.msra.mxu0 %v136_v24 }
  0x14   :  { %197 = vmatpush1.bf16.msra.mxu1 %v142_v25 }
  0x16   :  { %258 = vmatmul.mubr.msk.bf16.vlgmr.msra.gmra.mrb[0].mxu0 %vm130_vm1, %v15_v26 }
  0x17   :  { %260 = vmatmul.mubr.msk.bf16.vlgmr.msra.gmra.mrb[0].mxu1 %vm130_vm1, %v15_v26 }
  0x88   :  { %v38_v27 = vpop.permute.xlu0 %37 }
  0xe9   :  { %v181_v28 = vpop.f32.mrb[0].mxu0 }
  0xea   :  { %v222_v29 = vpop.f32.mrb[0].mxu1  ;;  %v182_v30 = vadd.f32 %v181_v28, %v38_v27  ;;  %v183_v32 = vpop.f32.mrb[1].mxu0 }
  0xeb   :  { %v223_v31 = vadd.f32 %v222_v29, %v38_v27  ;;  %v224_v33 = vpop.f32.mrb[1].mxu1  ;;  %v184_v34 = vadd.f32 %v183_v32, %v38_v27  ;;  %v185_v36 = vpop.f32.mrb[2].mxu0 }
  0xec   :  { %v225_v35 = vadd.f32 %v224_v33, %v38_v27  ;;  %v226_v37 = vpop.f32.mrb[2].mxu1  ;;  %229 = vst [vmem:[%s387_s3] sm:$0xff] %v182_v30  ;;  %v186_v38 = vpop.f32.mrb[3].mxu0 }
  0xed   :  { %231 = vst [vmem:[%s387_s3 + $0x10] sm:$0xff] %v223_v31  ;;  %v227_v39 = vpop.f32.mrb[3].mxu1  ;;  %230 = vst [vmem:[%s387_s3 + $0x8] sm:$0xff] %v184_v34 }
  0xee   :  { %232 = vst [vmem:[%s387_s3 + $0x18] sm:$0xff] %v225_v35 }

// kernel: sc_mix_blk_forward.7
= control target key start
LH: loop header
LB: loop body
LE: loop exit
PB: predicated region body
PF: predicated region fallthrough
CT: control target
= control target key end

     0   :  { %v436_v1 = vmov 0   ;;  %vm244_vm0 = vcmask 130048   ;;  %s583_s1 = inlined_call_operand.vmem [shape: bf16[144,512], index: 1, kind: input, shape index: {}]   ;;  %s584_s0 = inlined_call_operand.vmem [shape: bf16[8,144], index: 0, kind: input, shape index: {}]   ;;  %s585_s2 = inlined_call_operand.vmem [shape: f32[8,1], index: 2, kind: input, shape index: {}]   ;;  %s586_s3 = inlined_call_operand.vmem [shape: f32[8,512], index: 3, kind: output, shape index: {}]  }
   0x1   :  { %v380_v0 = vld [vmem:[%s583_s1 + $0x4] ss:$16 sps:$4 sm:$0xff]   ;;  %379 = vset.pattern.permute.xlu0 %v436_v1  ;;  %v382_v2 = vld [vmem:[%s583_s1 + $0xc] ss:$16 sps:$4 sm:$0xff]   ;;  %v384_v3 = vld [vmem:[%s583_s1] ss:$16 sps:$4 sm:$0xff]  }
   0x2   :  { %248 = vmatprep.subr.bf16.mxu0 %v380_v0  ;;  %v385_v4 = vld [vmem:[%s583_s1 + $0x8] ss:$16 sps:$4 sm:$0xff]   ;;  %289 = vmatprep.subr.bf16.mxu1 %v382_v2  ;;  %v386_v5 = vld [vmem:[%s583_s1 + $0x24] ss:$16 sps:$4 sm:$0xff]   ;;  %v388_v6 = vld [vmem:[%s583_s1 + $0x2c] ss:$16 sps:$4 sm:$0xff]  }
   0x3   :  { %249 = vmatpush1.bf16.msra.mxu0 %v384_v3  ;;  %290 = vmatpush1.bf16.msra.mxu1 %v385_v4  ;;  %v390_v7 = vld [vmem:[%s583_s1 + $0x20] ss:$16 sps:$4 sm:$0xff]   ;;  %v391_v8 = vld [vmem:[%s583_s1 + $0x28] ss:$16 sps:$4 sm:$0xff]   ;;  %v392_v9 = vld [vmem:[%s583_s1 + $0x44] ss:$16 sps:$4 sm:$0xff]  }
   0x4   :  { %250 = vmatprep.subr.bf16.mxu0 %v386_v5  ;;  %291 = vmatprep.subr.bf16.mxu1 %v388_v6  ;;  %v394_v10 = vld [vmem:[%s583_s1 + $0x4c] ss:$16 sps:$4 sm:$0xff]   ;;  %v396_v11 = vld [vmem:[%s583_s1 + $0x40] ss:$16 sps:$4 sm:$0xff]   ;;  %v397_v12 = vld [vmem:[%s583_s1 + $0x48] ss:$16 sps:$4 sm:$0xff]  }
   0x5   :  { %v398_v13 = vld [vmem:[%s583_s1 + $0x64] ss:$16 sps:$4 sm:$0xff]   ;;  %v400_v14 = vld [vmem:[%s583_s1 + $0x6c] ss:$16 sps:$4 sm:$0xff]   ;;  %v402_v15 = vld [vmem:[%s583_s1 + $0x60] ss:$16 sps:$4 sm:$0xff]  }
   0x6   :  { %v403_v16 = vld [vmem:[%s583_s1 + $0x68] ss:$16 sps:$4 sm:$0xff]   ;;  %v404_v17 = vld [vmem:[%s583_s1 + $0x84] ss:$16 sps:$4 sm:$0xff]   ;;  %v406_v18 = vld [vmem:[%s583_s1 + $0x8c] ss:$16 sps:$4 sm:$0xff]  }
   0x7   :  { %251 = vmatpush1.bf16.msra.mxu0 %v390_v7  ;;  %292 = vmatpush1.bf16.msra.mxu1 %v391_v8  ;;  %v408_v19 = vld [vmem:[%s583_s1 + $0x80] ss:$16 sps:$4 sm:$0xff]   ;;  %v409_v20 = vld [vmem:[%s583_s1 + $0x88] ss:$16 sps:$4 sm:$0xff]   ;;  %v410_v21 = vld [vmem:[%s583_s1 + $0xa4] ss:$16 sps:$4 sm:$0xff]  }
   0x8   :  { %252 = vmatprep.subr.bf16.mxu0 %v392_v9  ;;  %293 = vmatprep.subr.bf16.mxu1 %v394_v10  ;;  %v412_v22 = vld [vmem:[%s583_s1 + $0xac] ss:$16 sps:$4 sm:$0xff]   ;;  %v414_v23 = vld [vmem:[%s583_s1 + $0xa0] ss:$16 sps:$4 sm:$0xff]   ;;  %v415_v24 = vld [vmem:[%s583_s1 + $0xa8] ss:$16 sps:$4 sm:$0xff]  }
   0x9   :  { %v416_v25 = vld [vmem:[%s583_s1 + $0xc4] ss:$16 sps:$4 sm:$0xff]   ;;  %v418_v26 = vld [vmem:[%s583_s1 + $0xcc] ss:$16 sps:$4 sm:$0xff]   ;;  %v420_v27 = vld [vmem:[%s583_s1 + $0xc0] ss:$16 sps:$4 sm:$0xff]  }
   0xa   :  { %v421_v28 = vld [vmem:[%s583_s1 + $0xc8] ss:$16 sps:$4 sm:$0xff]   ;;  %v15_v29 = vld [vmem:[%s584_s0] sm:$0xff]  ;;  %v424_v32 = vld [vmem:[%s583_s1 + $0xec] ss:$16 sps:$4 sm:$0xff]  }
   0xb   :  { %253 = vmatpush1.bf16.msra.mxu0 %v396_v11  ;;  %294 = vmatpush1.bf16.msra.mxu1 %v397_v12  ;;  %v52_v30 = vld [vmem:[%s585_s2] sm:$0xff]  ;;  %v339_v33 = vcombine.high %v15_v29, %v15_v29  ;;  %v427_v35 = vld [vmem:[%s583_s1 + $0xe8] ss:$16 sps:$4 sm:$0xff]   ;;  %v430_v37 = vld [vmem:[%s583_s1 + $0x10c] ss:$16 sps:$4 sm:$0xff]   ;;  %v338_v40 = vcombine.low %v15_v29, %v15_v29 }
   0xc   :  { %254 = vmatprep.subr.bf16.mxu0 %v398_v13  ;;  %295 = vmatprep.subr.bf16.mxu1 %v400_v14  ;;  %v422_v31 = vld [vmem:[%s583_s1 + $0xe4] ss:$16 sps:$4 sm:$0xff]   ;;  %v426_v34 = vld [vmem:[%s583_s1 + $0xe0] ss:$16 sps:$4 sm:$0xff]   ;;  %v433_v39 = vld [vmem:[%s583_s1 + $0x108] ss:$16 sps:$4 sm:$0xff]  }
   0xd   :  { %55 = vperm.xlu0 %379, %v52_v30   ;;  %376 = vmatprep.mubr.msk.bf16.mxu0 %vm244_vm0, %v339_v33  ;;  %v428_v36 = vld [vmem:[%s583_s1 + $0x104] ss:$16 sps:$4 sm:$0xff]   ;;  %v432_v38 = vld [vmem:[%s583_s1 + $0x100] ss:$16 sps:$4 sm:$0xff]  }
   0xe   :  { %377 = vmatprep.mubr.msk.bf16.mxu1 %vm244_vm0, %v339_v33 }
   0xf   :  { %255 = vmatpush1.bf16.msra.mxu0 %v402_v15  ;;  %296 = vmatpush1.bf16.msra.mxu1 %v403_v16 }
  0x10   :  { %256 = vmatprep.subr.bf16.mxu0 %v404_v17  ;;  %297 = vmatprep.subr.bf16.mxu1 %v406_v18 }
  0x13   :  { %257 = vmatpush1.bf16.msra.mxu0 %v408_v19  ;;  %298 = vmatpush1.bf16.msra.mxu1 %v409_v20 }
  0x14   :  { %258 = vmatprep.subr.bf16.mxu0 %v410_v21  ;;  %299 = vmatprep.subr.bf16.mxu1 %v412_v22 }
  0x17   :  { %259 = vmatpush1.bf16.msra.mxu0 %v414_v23  ;;  %300 = vmatpush1.bf16.msra.mxu1 %v415_v24 }
  0x18   :  { %260 = vmatprep.subr.bf16.mxu0 %v416_v25  ;;  %301 = vmatprep.subr.bf16.mxu1 %v418_v26 }
  0x1b   :  { %261 = vmatpush1.bf16.msra.mxu0 %v420_v27  ;;  %302 = vmatpush1.bf16.msra.mxu1 %v421_v28 }
  0x1c   :  { %262 = vmatprep.subr.bf16.mxu0 %v422_v31  ;;  %303 = vmatprep.subr.bf16.mxu1 %v424_v32 }
  0x1f   :  { %263 = vmatpush1.bf16.msra.mxu0 %v426_v34  ;;  %304 = vmatpush1.bf16.msra.mxu1 %v427_v35 }
  0x20   :  { %264 = vmatprep.subr.bf16.mxu0 %v428_v36  ;;  %305 = vmatprep.subr.bf16.mxu1 %v430_v37 }
  0x23   :  { %265 = vmatpush1.bf16.msra.mxu0 %v432_v38  ;;  %306 = vmatpush1.bf16.msra.mxu1 %v433_v39 }
  0x26   :  { %281 = vmatmul.mubr.bf16.vlgmr.msra.gmra.mrb[0].mxu0 %v338_v40  ;;  %322 = vmatmul.mubr.bf16.vlgmr.msra.gmra.mrb[0].mxu1 %v338_v40 }
  0x8c   :  { %v56_v41 = vpop.permute.xlu0 %55 }
  0xf9   :  { %v282_v42 = vpop.f32.mrb[0].mxu0  ;;  %v323_v43 = vpop.f32.mrb[0].mxu1 }
  0xfa   :  { %v283_v44 = vadd.f32 %v282_v42, %v56_v41  ;;  %v324_v45 = vadd.f32 %v323_v43, %v56_v41  ;;  %v284_v46 = vpop.f32.mrb[1].mxu0  ;;  %v325_v47 = vpop.f32.mrb[1].mxu1 }
  0xfb   :  { %v285_v48 = vadd.f32 %v284_v46, %v56_v41  ;;  %v326_v49 = vadd.f32 %v325_v47, %v56_v41  ;;  %v286_v50 = vpop.f32.mrb[2].mxu0  ;;  %v327_v51 = vpop.f32.mrb[2].mxu1 }
  0xfc   :  { %330 = vst [vmem:[%s586_s3] sm:$0xff] %v283_v44  ;;  %332 = vst [vmem:[%s586_s3 + $0x10] sm:$0xff] %v324_v45  ;;  %v287_v52 = vpop.f32.mrb[3].mxu0  ;;  %v328_v53 = vpop.f32.mrb[3].mxu1 }
  0xfd   :  { %331 = vst [vmem:[%s586_s3 + $0x8] sm:$0xff] %v285_v48  ;;  %333 = vst [vmem:[%s586_s3 + $0x18] sm:$0xff] %v326_v49 }

// kernel: sc_mix_blk_forward.6
= control target key start
LH: loop header
LB: loop body
LE: loop exit
PB: predicated region body
PF: predicated region fallthrough
CT: control target
= control target key end

     0   :  { %v483_v1 = vmov 0   ;;  %vm254_vm0 = vcmask 130048   ;;  %s636_s1 = inlined_call_operand.vmem [shape: bf16[144,512], index: 1, kind: input, shape index: {}]   ;;  %s637_s0 = inlined_call_operand.vmem [shape: bf16[16,144], index: 0, kind: input, shape index: {}]   ;;  %s638_s2 = inlined_call_operand.vmem [shape: f32[16,1], index: 2, kind: input, shape index: {}]   ;;  %s639_s3 = inlined_call_operand.vmem [shape: bf16[16,512], index: 3, kind: output, shape index: {}]  }
   0x1   :  { %v426_v0 = vld [vmem:[%s636_s1 + $0x4] ss:$16 sps:$4 sm:$0xff]   ;;  %425 = vset.pattern.permute.xlu0 %v483_v1  ;;  %v428_v2 = vld [vmem:[%s636_s1 + $0xc] ss:$16 sps:$4 sm:$0xff]   ;;  %v430_v3 = vld [vmem:[%s636_s1] ss:$16 sps:$4 sm:$0xff]  }
   0x2   :  { %258 = vmatprep.subr.bf16.mxu0 %v426_v0  ;;  %v431_v4 = vld [vmem:[%s636_s1 + $0x8] ss:$16 sps:$4 sm:$0xff]   ;;  %301 = vmatprep.subr.bf16.mxu1 %v428_v2  ;;  %v432_v5 = vld [vmem:[%s636_s1 + $0x24] ss:$16 sps:$4 sm:$0xff]   ;;  %v434_v6 = vld [vmem:[%s636_s1 + $0x2c] ss:$16 sps:$4 sm:$0xff]  }
   0x3   :  { %259 = vmatpush1.bf16.msra.mxu0 %v430_v3  ;;  %302 = vmatpush1.bf16.msra.mxu1 %v431_v4  ;;  %v436_v7 = vld [vmem:[%s636_s1 + $0x20] ss:$16 sps:$4 sm:$0xff]   ;;  %v437_v8 = vld [vmem:[%s636_s1 + $0x28] ss:$16 sps:$4 sm:$0xff]   ;;  %v438_v9 = vld [vmem:[%s636_s1 + $0x44] ss:$16 sps:$4 sm:$0xff]  }
   0x4   :  { %260 = vmatprep.subr.bf16.mxu0 %v432_v5  ;;  %303 = vmatprep.subr.bf16.mxu1 %v434_v6  ;;  %v440_v10 = vld [vmem:[%s636_s1 + $0x4c] ss:$16 sps:$4 sm:$0xff]   ;;  %v442_v11 = vld [vmem:[%s636_s1 + $0x40] ss:$16 sps:$4 sm:$0xff]   ;;  %v443_v12 = vld [vmem:[%s636_s1 + $0x48] ss:$16 sps:$4 sm:$0xff]  }
   0x5   :  { %v444_v13 = vld [vmem:[%s636_s1 + $0x64] ss:$16 sps:$4 sm:$0xff]   ;;  %v446_v14 = vld [vmem:[%s636_s1 + $0x6c] ss:$16 sps:$4 sm:$0xff]   ;;  %v448_v15 = vld [vmem:[%s636_s1 + $0x60] ss:$16 sps:$4 sm:$0xff]  }
   0x6   :  { %v449_v16 = vld [vmem:[%s636_s1 + $0x68] ss:$16 sps:$4 sm:$0xff]   ;;  %v450_v17 = vld [vmem:[%s636_s1 + $0x84] ss:$16 sps:$4 sm:$0xff]   ;;  %v452_v18 = vld [vmem:[%s636_s1 + $0x8c] ss:$16 sps:$4 sm:$0xff]  }
   0x7   :  { %261 = vmatpush1.bf16.msra.mxu0 %v436_v7  ;;  %304 = vmatpush1.bf16.msra.mxu1 %v437_v8  ;;  %v454_v19 = vld [vmem:[%s636_s1 + $0x80] ss:$16 sps:$4 sm:$0xff]   ;;  %v455_v20 = vld [vmem:[%s636_s1 + $0x88] ss:$16 sps:$4 sm:$0xff]   ;;  %v456_v21 = vld [vmem:[%s636_s1 + $0xa4] ss:$16 sps:$4 sm:$0xff]  }
   0x8   :  { %262 = vmatprep.subr.bf16.mxu0 %v438_v9  ;;  %305 = vmatprep.subr.bf16.mxu1 %v440_v10  ;;  %v458_v22 = vld [vmem:[%s636_s1 + $0xac] ss:$16 sps:$4 sm:$0xff]   ;;  %v460_v23 = vld [vmem:[%s636_s1 + $0xa0] ss:$16 sps:$4 sm:$0xff]   ;;  %v461_v24 = vld [vmem:[%s636_s1 + $0xa8] ss:$16 sps:$4 sm:$0xff]  }
   0x9   :  { %v462_v25 = vld [vmem:[%s636_s1 + $0xc4] ss:$16 sps:$4 sm:$0xff]   ;;  %v464_v26 = vld [vmem:[%s636_s1 + $0xcc] ss:$16 sps:$4 sm:$0xff]   ;;  %v466_v27 = vld [vmem:[%s636_s1 + $0xc0] ss:$16 sps:$4 sm:$0xff]  }
   0xa   :  { %v467_v28 = vld [vmem:[%s636_s1 + $0xc8] ss:$16 sps:$4 sm:$0xff]   ;;  %v468_v29 = vld [vmem:[%s636_s1 + $0xe4] ss:$16 sps:$4 sm:$0xff]   ;;  %v470_v30 = vld [vmem:[%s636_s1 + $0xec] ss:$16 sps:$4 sm:$0xff]  }
   0xb   :  { %263 = vmatpush1.bf16.msra.mxu0 %v442_v11  ;;  %306 = vmatpush1.bf16.msra.mxu1 %v443_v12  ;;  %v482_v31 = vld [vmem:[%s637_s0 + $0x4] ss:$8 sps:$4 sm:$0xff]   ;;  %v472_v34 = vld [vmem:[%s636_s1 + $0xe0] ss:$16 sps:$4 sm:$0xff]   ;;  %v473_v35 = vld [vmem:[%s636_s1 + $0xe8] ss:$16 sps:$4 sm:$0xff]  }
   0xc   :  { %264 = vmatprep.subr.bf16.mxu0 %v444_v13  ;;  %307 = vmatprep.subr.bf16.mxu1 %v446_v14  ;;  %v53_v32 = vld [vmem:[%s638_s2] sm:$0xff]  ;;  %v54_v33 = vld [vmem:[%s638_s2 + $0x8] sm:$0xff] }
   0xd   :  { %57 = vperm.xlu0 %425, %v53_v32   ;;  %414 = vmatprep.mubr.msk.bf16.mxu0 %vm254_vm0, %v482_v31  ;;  %v474_v36 = vld [vmem:[%s636_s1 + $0x104] ss:$16 sps:$4 sm:$0xff]   ;;  %v476_v37 = vld [vmem:[%s636_s1 + $0x10c] ss:$16 sps:$4 sm:$0xff]   ;;  %v478_v38 = vld [vmem:[%s636_s1 + $0x100] ss:$16 sps:$4 sm:$0xff]  }
   0xe   :  { %415 = vmatprep.mubr.msk.bf16.mxu1 %vm254_vm0, %v482_v31  ;;  %v479_v39 = vld [vmem:[%s636_s1 + $0x108] ss:$16 sps:$4 sm:$0xff]  }
   0xf   :  { %265 = vmatpush1.bf16.msra.mxu0 %v448_v15  ;;  %308 = vmatpush1.bf16.msra.mxu1 %v449_v16  ;;  %v480_v40 = vld [vmem:[%s637_s0] ss:$8 sps:$4 sm:$0xff]  }
  0x10   :  { %266 = vmatprep.subr.bf16.mxu0 %v450_v17  ;;  %309 = vmatprep.subr.bf16.mxu1 %v452_v18 }
  0x11   :  { %62 = vperm.xlu0 %425, %v54_v33  }
  0x13   :  { %267 = vmatpush1.bf16.msra.mxu0 %v454_v19  ;;  %310 = vmatpush1.bf16.msra.mxu1 %v455_v20 }
  0x14   :  { %268 = vmatprep.subr.bf16.mxu0 %v456_v21  ;;  %311 = vmatprep.subr.bf16.mxu1 %v458_v22 }
  0x17   :  { %269 = vmatpush1.bf16.msra.mxu0 %v460_v23  ;;  %312 = vmatpush1.bf16.msra.mxu1 %v461_v24 }
  0x18   :  { %270 = vmatprep.subr.bf16.mxu0 %v462_v25  ;;  %313 = vmatprep.subr.bf16.mxu1 %v464_v26 }
  0x1b   :  { %271 = vmatpush1.bf16.msra.mxu0 %v466_v27  ;;  %314 = vmatpush1.bf16.msra.mxu1 %v467_v28 }
  0x1c   :  { %272 = vmatprep.subr.bf16.mxu0 %v468_v29  ;;  %315 = vmatprep.subr.bf16.mxu1 %v470_v30 }
  0x1f   :  { %273 = vmatpush1.bf16.msra.mxu0 %v472_v34  ;;  %316 = vmatpush1.bf16.msra.mxu1 %v473_v35 }
  0x20   :  { %274 = vmatprep.subr.bf16.mxu0 %v474_v36  ;;  %317 = vmatprep.subr.bf16.mxu1 %v476_v37 }
  0x23   :  { %275 = vmatpush1.bf16.msra.mxu0 %v478_v38  ;;  %318 = vmatpush1.bf16.msra.mxu1 %v479_v39 }
  0x26   :  { %291 = vmatmul.mubr.bf16.vlgmr.msra.gmra.mrb[0].mxu0 %v480_v40  ;;  %334 = vmatmul.mubr.bf16.vlgmr.msra.gmra.mrb[0].mxu1 %v480_v40 }
  0x8c   :  { %v58_v41 = vpop.permute.xlu0 %57 }
  0x90   :  { %v63_v42 = vpop.permute.xlu0 %62 }
  0xf9   :  { %v292_v43 = vpop.f32.mrb[0].mxu0  ;;  %v335_v44 = vpop.f32.mrb[0].mxu1 }
  0xfa   :  { %v293_v45 = vadd.f32 %v292_v43, %v58_v41  ;;  %v336_v46 = vadd.f32 %v335_v44, %v58_v41  ;;  %v294_v47 = vpop.f32.mrb[1].mxu0  ;;  %v337_v48 = vpop.f32.mrb[1].mxu1 }
  0xfb   :  { %v295_v49 = vadd.f32 %v294_v47, %v58_v41  ;;  %v338_v50 = vadd.f32 %v337_v48, %v58_v41  ;;  %v296_v51 = vpop.f32.mrb[2].mxu0  ;;  %v339_v52 = vpop.f32.mrb[2].mxu1 }
  0xfc   :  { %v297_v53 = vadd.f32 %v296_v51, %v63_v42  ;;  %v340_v54 = vadd.f32 %v339_v52, %v63_v42  ;;  %v298_v55 = vpop.f32.mrb[3].mxu0  ;;  %v341_v56 = vpop.f32.mrb[3].mxu1 }
  0xfd   :  { %v420_v57 = vpack.c.bf16 %v295_v49, %v293_v45  ;;  %v421_v58 = vpack.c.bf16 %v338_v50, %v336_v46  ;;  %v299_v59 = vadd.f32 %v298_v55, %v63_v42  ;;  %v342_v60 = vadd.f32 %v341_v56, %v63_v42 }
  0xff   :  { %368 = vst [vmem:[%s639_s3] sm:$0xff] %v420_v57  ;;  %369 = vst [vmem:[%s639_s3 + $0x8] sm:$0xff] %v421_v58  ;;  %v422_v61 = vpack.c.bf16 %v299_v59, %v297_v53  ;;  %v423_v62 = vpack.c.bf16 %v342_v60, %v340_v54 }
 0x101   :  { %370 = vst [vmem:[%s639_s3 + $0x10] sm:$0xff] %v422_v61  ;;  %371 = vst [vmem:[%s639_s3 + $0x18] sm:$0xff] %v423_v62 }

</bundles_post_ra>
